<compile_context>
chip_gen: v6e
topology: v6e:2x2x1
jax: 0.10.0
libtpu: 0.0.40
codegen_flags: <defaults>
</compile_context>

<pallas_src>
import jax
import jax.numpy as jnp
from jax.experimental import pallas as pl
from jax.experimental.pallas import tpu as pltpu


# -----------------------------------------------------------------------------
# Pallas kernel: whole decoder forward, single grid point, all refs in VMEM.
# -----------------------------------------------------------------------------
def decoder_kernel(p_ref, zc_ref,
                   wp_ref,                 # fc_p weight          (D, H)      f32
                   wcond_ref, bcond_ref,   # stacked conditioning (Z+C, 13H), (1, 13H) f32
                   w_ref,                  # fc_0..fc_4 weights   (5, H, H)   bf16
                   wo_ref, bo_ref,         # fc_out               (1, H), (1, 1) f32
                   out_ref):               # output               (1, B*T)    f32 (lane-dense)
    BT, D = p_ref.shape
    H = wp_ref.shape[1]
    B = zc_ref.shape[0]
    T = BT // B
    eps = 1e-5

    # --- all conditioning in one small matmul: [fc_z(z) | gamma_0..5 | beta_0..5]
    cond = jnp.dot(zc_ref[...], wcond_ref[...],
                   preferred_element_type=jnp.float32) + bcond_ref[...]      # (B, 13H)
    zp = cond[:, 0:H]                                                        # (B, H)

    def cbn_relu(x, k, out_dtype):
        """relu(CBN_k(x)): x (BT, H) f32 -> (BT, H) out_dtype (bf16 feeds next matmul)."""
        # One-pass training-mode batch stats (biased variance), f32 accumulation.
        # NOTE: E[x^2]-E[x]^2 can cancel for very large activation magnitudes;
        # fine at this scale in f32 — switch to two-pass stats for deep /
        # real-weight runs.
        mean = jnp.mean(x, axis=0, keepdims=True)                 # (1, H)
        ex2 = jnp.mean(x * x, axis=0, keepdims=True)              # (1, H)
        var = jnp.maximum(ex2 - mean * mean, 0.0)
        inv = jax.lax.rsqrt(var + eps)                            # EUP, (1, H)
        gamma = cond[:, (1 + k) * H:(2 + k) * H]                  # (B, H)
        beta = cond[:, (7 + k) * H:(8 + k) * H]                   # (B, H)
        scale = gamma * inv                                       # (B, H)
        shift = beta - mean * scale                               # (B, H)
        # scale + shift + relu + down-cast in one pass through a free (B,T,H) view
        y = x.reshape(B, T, H) * scale[:, None, :] + shift[:, None, :]
        return jnp.maximum(y, 0.0).reshape(BT, H).astype(out_dtype)

    # --- fc_p as D(=3) broadcast FMAs on the VPU (bias dropped: cancels under BN;
    # a K=3 f32 MXU matmul would waste a padded push/drain on the critical path)
    pv = p_ref[...]                                               # (BT, D)
    net = pv[:, 0:1] * wp_ref[0:1, :]
    for d in range(1, D):
        net = net + pv[:, d:d + 1] * wp_ref[d:d + 1, :]
    # + fc_z(z), broadcast over the T points of each batch element (bias dropped)
    net = (net.reshape(B, T, H) + zp[:, None, :]).reshape(BT, H)

    net = cbn_relu(net, 0, jnp.bfloat16)
    for i in range(5):
        # fc_i biases omitted: per-channel constants cancel under the
        # following training-mode BatchNorm.
        y = jnp.dot(net, w_ref[i], preferred_element_type=jnp.float32)
        net = cbn_relu(y, i + 1, jnp.bfloat16 if i < 4 else jnp.float32)

    # --- fc_out: (1, H) @ (H, BT) -> lane-dense (1, BT) row.
    # (fc_out bias kept: nothing normalizes after it.)
    out_ref[...] = jnp.dot(wo_ref[...], net.T,
                           preferred_element_type=jnp.float32) + bo_ref[...]


# -----------------------------------------------------------------------------
# One-time parameter preprocessing (hoisted out of the per-call path)
# -----------------------------------------------------------------------------
def prepare_params(params):
    H = params["wp_t"].shape[1]
    z_dim = params["wz_t"].shape[0]
    c_dim = params["wg_t"].shape[1]

    # Stacked block-diagonal conditioning weight:
    #   columns [0:H]     -> fc_z        (rows 0:z_dim)   (bias dropped: cancels under BN)
    #   columns [H:7H]    -> gamma_0..5  (rows z_dim:)
    #   columns [7H:13H]  -> beta_0..5   (rows z_dim:)
    wg_flat = params["wg_t"].transpose(1, 0, 2).reshape(c_dim, 6 * H)
    wb_flat = params["wb_t"].transpose(1, 0, 2).reshape(c_dim, 6 * H)
    w_cond = jnp.zeros((z_dim + c_dim, 13 * H), jnp.float32)
    w_cond = w_cond.at[:z_dim, :H].set(params["wz_t"])
    w_cond = w_cond.at[z_dim:, H:7 * H].set(wg_flat)
    w_cond = w_cond.at[z_dim:, 7 * H:].set(wb_flat)
    b_cond = jnp.concatenate(
        [jnp.zeros((1, H), jnp.float32),        # fc_p/fc_z biases cancel under training-mode BN
         params["bg"].reshape(1, 6 * H),
         params["bb"].reshape(1, 6 * H)], axis=1)

    return {
        "wp_t": params["wp_t"],
        "w_cond": w_cond,
        "b_cond": b_cond,
        "w_hid": params["w_t"].astype(jnp.bfloat16),   # bf16 MXU operands, cast once
        # fc_0..fc_4 biases intentionally dropped (cancel under training-mode BN)
        "wo_row": params["wo_t"].reshape(1, H),
        "bo": params["bo"],
    }


# -----------------------------------------------------------------------------
# Wrapper
# -----------------------------------------------------------------------------
def decoder_forward(p, z, c, prep):
    """p: (B, T, dim), z: (B, z_dim), c: (B, c_dim) -> (B, T)."""
    B, T, D = p.shape
    p2 = p.reshape(B * T, D)
    zc = jnp.concatenate([z, c], axis=-1)                # (B, z_dim + c_dim)

    args = (p2, zc, prep["wp_t"], prep["w_cond"], prep["b_cond"],
            prep["w_hid"], prep["wo_row"], prep["bo"])

    out = pl.pallas_call(
        decoder_kernel,
        out_shape=jax.ShapeDtypeStruct((1, B * T), jnp.float32),   # lane-dense store
        in_specs=[pl.BlockSpec(memory_space=pltpu.MemorySpace.VMEM)] * len(args),
        out_specs=pl.BlockSpec(memory_space=pltpu.MemorySpace.VMEM),
        # 32 MiB is ample at demo size and safe on all generations (v5e default
        # scoped VMEM is only 16 MiB).  Re-derive for large B*T per generation
        # (<= ~48 MiB on v7x's 64 MiB; can go 64-100 MiB on v6e's 128 MiB).
        compiler_params=pltpu.CompilerParams(vmem_limit_bytes=32 * 1024 * 1024),
    )(*args)
    return out.reshape(B, T)


# -----------------------------------------------------------------------------
# Deterministic parameter init (synthetic; shapes follow the nn.Module)
# -----------------------------------------------------------------------------
def init_params(key, dim=3, z_dim=16, c_dim=16, hidden=128):
    ks = jax.random.split(key, 16)
    s = 0.1
    return {
        # weights are stored pre-transposed so the kernel does x @ W
        "wp_t": s * jax.random.normal(ks[0], (dim, hidden), jnp.float32),
        "bp":   s * jax.random.normal(ks[1], (1, hidden), jnp.float32),
        "wz_t": s * jax.random.normal(ks[2], (z_dim, hidden), jnp.float32),
        "bz":   s * jax.random.normal(ks[3], (1, hidden), jnp.float32),
        "w_t":  s * jax.random.normal(ks[4], (5, hidden, hidden), jnp.float32),
        "b":    s * jax.random.normal(ks[5], (5, 1, hidden), jnp.float32),
        "wg_t": s * jax.random.normal(ks[6], (6, c_dim, hidden), jnp.float32),
        "bg":   1.0 + s * jax.random.normal(ks[7], (6, 1, hidden), jnp.float32),
        "wb_t": s * jax.random.normal(ks[8], (6, c_dim, hidden), jnp.float32),
        "bb":   s * jax.random.normal(ks[9], (6, 1, hidden), jnp.float32),
        "wo_t": s * jax.random.normal(ks[10], (hidden, 1), jnp.float32),
        "bo":   s * jax.random.normal(ks[11], (1, 1), jnp.float32),
    }


# -----------------------------------------------------------------------------
# Pure-JAX reference (mirrors the PyTorch forward, all biases, f32 throughout)
# -----------------------------------------------------------------------------
def reference_forward(p, z, c, P):
    eps = 1e-5

    def cbn(x, k):  # x: (B, T, H)
        gamma = c @ P["wg_t"][k] + P["bg"][k]   # (B, H)
        beta = c @ P["wb_t"][k] + P["bb"][k]
        mean = jnp.mean(x, axis=(0, 1), keepdims=True)
        var = jnp.mean((x - mean) ** 2, axis=(0, 1), keepdims=True)
        xn = (x - mean) / jnp.sqrt(var + eps)
        return gamma[:, None, :] * xn + beta[:, None, :]

    act = lambda v: jnp.maximum(v, 0.0)

    net = p @ P["wp_t"] + P["bp"]               # (B, T, H)
    net_z = z @ P["wz_t"] + P["bz"]             # (B, H)
    net = net + net_z[:, None, :]
    net = act(cbn(net, 0))
    for i in range(5):
        net = net @ P["w_t"][i] + P["b"][i]
        net = act(cbn(net, i + 1))
    out = net @ P["wo_t"] + P["bo"]             # (B, T, 1)
    return out[..., 0]


if __name__ == "__main__":
    B, T, DIM, Z_DIM, C_DIM, HIDDEN = 2, 64, 3, 16, 16, 128

    key = jax.random.PRNGKey(0)
    kp, kz, kc, kw = jax.random.split(key, 4)
    p = jax.random.normal(kp, (B, T, DIM), jnp.float32)
    z = jax.random.normal(kz, (B, Z_DIM), jnp.float32)
    c = jax.random.normal(kc, (B, C_DIM), jnp.float32)
    params = init_params(kw, DIM, Z_DIM, C_DIM, HIDDEN)

    # One-time parameter prep, hoisted out of the per-call (jitted) path.
    prep = jax.block_until_ready(prepare_params(params))

    fwd = jax.jit(decoder_forward)
    out = jax.block_until_ready(fwd(p, z, c, prep))

    ref = reference_forward(p, z, c, params)
    assert out.shape == (B, T), out.shape
    # bf16 MXU operands on the 5 hidden matmuls (reference is pure f32), hence
    # a slightly looser tolerance than a pure-f32 comparison.
    assert jnp.allclose(out, ref, atol=5e-2, rtol=5e-2), (
        float(jnp.max(jnp.abs(out - ref))))

    print("KERNEL_OK")
</pallas_src>

<mosaic_0001>
module attributes {stable_mosaic.version = 11 : i64} {
  func.func @decoder_kernel(%arg0: memref<128x3xf32, #tpu.memory_space<vmem>>, %arg1: memref<2x32xf32, #tpu.memory_space<vmem>>, %arg2: memref<3x128xf32, #tpu.memory_space<vmem>>, %arg3: memref<32x1664xf32, #tpu.memory_space<vmem>>, %arg4: memref<1x1664xf32, #tpu.memory_space<vmem>>, %arg5: memref<5x128x128xbf16, #tpu.memory_space<vmem>>, %arg6: memref<1x128xf32, #tpu.memory_space<vmem>>, %arg7: memref<1x1xf32, #tpu.memory_space<vmem>>, %arg8: memref<1x128xf32, #tpu.memory_space<vmem>>) attributes {dimension_semantics = [], scalar_prefetch = 0 : i64, scratch_operands = 0 : i64, tpu.core_type = #tpu.core_type<tc>} {
    %c0 = arith.constant 0 : index
    %c0_0 = arith.constant 0 : index
    %0 = vector.load %arg1[%c0, %c0_0] : memref<2x32xf32, #tpu.memory_space<vmem>>, vector<2x32xf32>
    %c0_1 = arith.constant 0 : index
    %c0_2 = arith.constant 0 : index
    %1 = vector.load %arg3[%c0_1, %c0_2] : memref<32x1664xf32, #tpu.memory_space<vmem>>, vector<32x1664xf32>
    %cst = arith.constant dense<0.000000e+00> : vector<2x1664xf32>
    %2 = tpu.matmul %0, %1, %cst {dimension_numbers = #tpu.dot_dimension_numbers<[1], [0], [0], [1], [0, 0, 1, 1], [], []>} : vector<2x32xf32>, vector<32x1664xf32>, vector<2x1664xf32> -> vector<2x1664xf32>
    %c0_3 = arith.constant 0 : index
    %c0_4 = arith.constant 0 : index
    %3 = vector.load %arg4[%c0_3, %c0_4] : memref<1x1664xf32, #tpu.memory_space<vmem>>, vector<1x1664xf32>
    %4 = vector.broadcast %3 : vector<1x1664xf32> to vector<2x1664xf32>
    %5 = arith.addf %2, %4 : vector<2x1664xf32>
    %6 = vector.extract_strided_slice %5 {offsets = [0, 0], sizes = [2, 128], strides = [1, 1]} : vector<2x1664xf32> to vector<2x128xf32>
    %c0_5 = arith.constant 0 : index
    %c0_6 = arith.constant 0 : index
    %7 = vector.load %arg0[%c0_5, %c0_6] : memref<128x3xf32, #tpu.memory_space<vmem>>, vector<128x3xf32>
    %8 = vector.extract_strided_slice %7 {offsets = [0, 0], sizes = [128, 1], strides = [1, 1]} : vector<128x3xf32> to vector<128x1xf32>
    %c0_7 = arith.constant 0 : index
    %c0_8 = arith.constant 0 : index
    %9 = vector.load %arg2[%c0_7, %c0_8] : memref<3x128xf32, #tpu.memory_space<vmem>>, vector<1x128xf32>
    %10 = vector.broadcast %8 : vector<128x1xf32> to vector<128x128xf32>
    %11 = vector.broadcast %9 : vector<1x128xf32> to vector<128x128xf32>
    %12 = arith.mulf %10, %11 : vector<128x128xf32>
    %13 = vector.extract_strided_slice %7 {offsets = [0, 1], sizes = [128, 1], strides = [1, 1]} : vector<128x3xf32> to vector<128x1xf32>
    %c1 = arith.constant 1 : index
    %c0_9 = arith.constant 0 : index
    %14 = vector.load %arg2[%c1, %c0_9] : memref<3x128xf32, #tpu.memory_space<vmem>>, vector<1x128xf32>
    %15 = vector.broadcast %13 : vector<128x1xf32> to vector<128x128xf32>
    %16 = vector.broadcast %14 : vector<1x128xf32> to vector<128x128xf32>
    %17 = arith.mulf %15, %16 : vector<128x128xf32>
    %18 = arith.addf %12, %17 : vector<128x128xf32>
    %19 = vector.extract_strided_slice %7 {offsets = [0, 2], sizes = [128, 1], strides = [1, 1]} : vector<128x3xf32> to vector<128x1xf32>
    %c2 = arith.constant 2 : index
    %c0_10 = arith.constant 0 : index
    %20 = vector.load %arg2[%c2, %c0_10] : memref<3x128xf32, #tpu.memory_space<vmem>>, vector<1x128xf32>
    %21 = vector.broadcast %19 : vector<128x1xf32> to vector<128x128xf32>
    %22 = vector.broadcast %20 : vector<1x128xf32> to vector<128x128xf32>
    %23 = arith.mulf %21, %22 : vector<128x128xf32>
    %24 = arith.addf %18, %23 : vector<128x128xf32>
    %25 = vector.shape_cast %24 : vector<128x128xf32> to vector<2x64x128xf32>
    %26 = vector.shape_cast %6 : vector<2x128xf32> to vector<2x1x128xf32>
    %27 = vector.broadcast %26 : vector<2x1x128xf32> to vector<2x64x128xf32>
    %28 = arith.addf %25, %27 : vector<2x64x128xf32>
    %29 = vector.shape_cast %28 : vector<2x64x128xf32> to vector<128x128xf32>
    %cst_11 = arith.constant dense<0.000000e+00> : vector<128xf32>
    %30 = vector.multi_reduction <add>, %29, %cst_11 [0] : vector<128x128xf32> to vector<128xf32>
    %31 = vector.shape_cast %30 : vector<128xf32> to vector<1x128xf32>
    %cst_12 = arith.constant 1.280000e+02 : f32
    %32 = vector.broadcast %cst_12 : f32 to vector<1x128xf32>
    %33 = arith.divf %31, %32 : vector<1x128xf32>
    %34 = arith.mulf %29, %29 : vector<128x128xf32>
    %cst_13 = arith.constant dense<0.000000e+00> : vector<128xf32>
    %35 = vector.multi_reduction <add>, %34, %cst_13 [0] : vector<128x128xf32> to vector<128xf32>
    %36 = vector.shape_cast %35 : vector<128xf32> to vector<1x128xf32>
    %cst_14 = arith.constant 1.280000e+02 : f32
    %37 = vector.broadcast %cst_14 : f32 to vector<1x128xf32>
    %38 = arith.divf %36, %37 : vector<1x128xf32>
    %39 = arith.mulf %33, %33 : vector<1x128xf32>
    %40 = arith.subf %38, %39 : vector<1x128xf32>
    %cst_15 = arith.constant 0.000000e+00 : f32
    %41 = vector.broadcast %cst_15 : f32 to vector<1x128xf32>
    %42 = arith.maximumf %40, %41 : vector<1x128xf32>
    %cst_16 = arith.constant 9.99999974E-6 : f32
    %43 = vector.broadcast %cst_16 : f32 to vector<1x128xf32>
    %44 = arith.addf %42, %43 : vector<1x128xf32>
    %45 = math.rsqrt %44 : vector<1x128xf32>
    %46 = vector.extract_strided_slice %5 {offsets = [0, 128], sizes = [2, 128], strides = [1, 1]} : vector<2x1664xf32> to vector<2x128xf32>
    %47 = vector.extract_strided_slice %5 {offsets = [0, 896], sizes = [2, 128], strides = [1, 1]} : vector<2x1664xf32> to vector<2x128xf32>
    %48 = vector.broadcast %45 : vector<1x128xf32> to vector<2x128xf32>
    %49 = arith.mulf %46, %48 : vector<2x128xf32>
    %50 = vector.broadcast %33 : vector<1x128xf32> to vector<2x128xf32>
    %51 = arith.mulf %50, %49 : vector<2x128xf32>
    %52 = arith.subf %47, %51 : vector<2x128xf32>
    %53 = vector.shape_cast %29 : vector<128x128xf32> to vector<2x64x128xf32>
    %54 = vector.shape_cast %49 : vector<2x128xf32> to vector<2x1x128xf32>
    %55 = vector.broadcast %54 : vector<2x1x128xf32> to vector<2x64x128xf32>
    %56 = arith.mulf %53, %55 : vector<2x64x128xf32>
    %57 = vector.shape_cast %52 : vector<2x128xf32> to vector<2x1x128xf32>
    %58 = vector.broadcast %57 : vector<2x1x128xf32> to vector<2x64x128xf32>
    %59 = arith.addf %56, %58 : vector<2x64x128xf32>
    %cst_17 = arith.constant 0.000000e+00 : f32
    %60 = vector.broadcast %cst_17 : f32 to vector<2x64x128xf32>
    %61 = arith.maximumf %59, %60 : vector<2x64x128xf32>
    %62 = vector.shape_cast %61 : vector<2x64x128xf32> to vector<128x128xf32>
    %63 = arith.truncf %62 : vector<128x128xf32> to vector<128x128xbf16>
    %c0_18 = arith.constant 0 : index
    %c0_19 = arith.constant 0 : index
    %c0_20 = arith.constant 0 : index
    %64 = vector.load %arg5[%c0_18, %c0_19, %c0_20] : memref<5x128x128xbf16, #tpu.memory_space<vmem>>, vector<1x128x128xbf16>
    %65 = vector.shape_cast %64 : vector<1x128x128xbf16> to vector<128x128xbf16>
    %cst_21 = arith.constant dense<0.000000e+00> : vector<128x128xf32>
    %66 = tpu.matmul %63, %65, %cst_21 {dimension_numbers = #tpu.dot_dimension_numbers<[1], [0], [0], [1], [0, 0, 1, 1], [], []>} : vector<128x128xbf16>, vector<128x128xbf16>, vector<128x128xf32> -> vector<128x128xf32>
    %cst_22 = arith.constant dense<0.000000e+00> : vector<128xf32>
    %67 = vector.multi_reduction <add>, %66, %cst_22 [0] : vector<128x128xf32> to vector<128xf32>
    %68 = vector.shape_cast %67 : vector<128xf32> to vector<1x128xf32>
    %cst_23 = arith.constant 1.280000e+02 : f32
    %69 = vector.broadcast %cst_23 : f32 to vector<1x128xf32>
    %70 = arith.divf %68, %69 : vector<1x128xf32>
    %71 = arith.mulf %66, %66 : vector<128x128xf32>
    %cst_24 = arith.constant dense<0.000000e+00> : vector<128xf32>
    %72 = vector.multi_reduction <add>, %71, %cst_24 [0] : vector<128x128xf32> to vector<128xf32>
    %73 = vector.shape_cast %72 : vector<128xf32> to vector<1x128xf32>
    %cst_25 = arith.constant 1.280000e+02 : f32
    %74 = vector.broadcast %cst_25 : f32 to vector<1x128xf32>
    %75 = arith.divf %73, %74 : vector<1x128xf32>
    %76 = arith.mulf %70, %70 : vector<1x128xf32>
    %77 = arith.subf %75, %76 : vector<1x128xf32>
    %cst_26 = arith.constant 0.000000e+00 : f32
    %78 = vector.broadcast %cst_26 : f32 to vector<1x128xf32>
    %79 = arith.maximumf %77, %78 : vector<1x128xf32>
    %cst_27 = arith.constant 9.99999974E-6 : f32
    %80 = vector.broadcast %cst_27 : f32 to vector<1x128xf32>
    %81 = arith.addf %79, %80 : vector<1x128xf32>
    %82 = math.rsqrt %81 : vector<1x128xf32>
    %83 = vector.extract_strided_slice %5 {offsets = [0, 256], sizes = [2, 128], strides = [1, 1]} : vector<2x1664xf32> to vector<2x128xf32>
    %84 = vector.extract_strided_slice %5 {offsets = [0, 1024], sizes = [2, 128], strides = [1, 1]} : vector<2x1664xf32> to vector<2x128xf32>
    %85 = vector.broadcast %82 : vector<1x128xf32> to vector<2x128xf32>
    %86 = arith.mulf %83, %85 : vector<2x128xf32>
    %87 = vector.broadcast %70 : vector<1x128xf32> to vector<2x128xf32>
    %88 = arith.mulf %87, %86 : vector<2x128xf32>
    %89 = arith.subf %84, %88 : vector<2x128xf32>
    %90 = vector.shape_cast %66 : vector<128x128xf32> to vector<2x64x128xf32>
    %91 = vector.shape_cast %86 : vector<2x128xf32> to vector<2x1x128xf32>
    %92 = vector.broadcast %91 : vector<2x1x128xf32> to vector<2x64x128xf32>
    %93 = arith.mulf %90, %92 : vector<2x64x128xf32>
    %94 = vector.shape_cast %89 : vector<2x128xf32> to vector<2x1x128xf32>
    %95 = vector.broadcast %94 : vector<2x1x128xf32> to vector<2x64x128xf32>
    %96 = arith.addf %93, %95 : vector<2x64x128xf32>
    %cst_28 = arith.constant 0.000000e+00 : f32
    %97 = vector.broadcast %cst_28 : f32 to vector<2x64x128xf32>
    %98 = arith.maximumf %96, %97 : vector<2x64x128xf32>
    %99 = vector.shape_cast %98 : vector<2x64x128xf32> to vector<128x128xf32>
    %100 = arith.truncf %99 : vector<128x128xf32> to vector<128x128xbf16>
    %c1_29 = arith.constant 1 : index
    %c0_30 = arith.constant 0 : index
    %c0_31 = arith.constant 0 : index
    %101 = vector.load %arg5[%c1_29, %c0_30, %c0_31] : memref<5x128x128xbf16, #tpu.memory_space<vmem>>, vector<1x128x128xbf16>
    %102 = vector.shape_cast %101 : vector<1x128x128xbf16> to vector<128x128xbf16>
    %cst_32 = arith.constant dense<0.000000e+00> : vector<128x128xf32>
    %103 = tpu.matmul %100, %102, %cst_32 {dimension_numbers = #tpu.dot_dimension_numbers<[1], [0], [0], [1], [0, 0, 1, 1], [], []>} : vector<128x128xbf16>, vector<128x128xbf16>, vector<128x128xf32> -> vector<128x128xf32>
    %cst_33 = arith.constant dense<0.000000e+00> : vector<128xf32>
    %104 = vector.multi_reduction <add>, %103, %cst_33 [0] : vector<128x128xf32> to vector<128xf32>
    %105 = vector.shape_cast %104 : vector<128xf32> to vector<1x128xf32>
    %cst_34 = arith.constant 1.280000e+02 : f32
    %106 = vector.broadcast %cst_34 : f32 to vector<1x128xf32>
    %107 = arith.divf %105, %106 : vector<1x128xf32>
    %108 = arith.mulf %103, %103 : vector<128x128xf32>
    %cst_35 = arith.constant dense<0.000000e+00> : vector<128xf32>
    %109 = vector.multi_reduction <add>, %108, %cst_35 [0] : vector<128x128xf32> to vector<128xf32>
    %110 = vector.shape_cast %109 : vector<128xf32> to vector<1x128xf32>
    %cst_36 = arith.constant 1.280000e+02 : f32
    %111 = vector.broadcast %cst_36 : f32 to vector<1x128xf32>
    %112 = arith.divf %110, %111 : vector<1x128xf32>
    %113 = arith.mulf %107, %107 : vector<1x128xf32>
    %114 = arith.subf %112, %113 : vector<1x128xf32>
    %cst_37 = arith.constant 0.000000e+00 : f32
    %115 = vector.broadcast %cst_37 : f32 to vector<1x128xf32>
    %116 = arith.maximumf %114, %115 : vector<1x128xf32>
    %cst_38 = arith.constant 9.99999974E-6 : f32
    %117 = vector.broadcast %cst_38 : f32 to vector<1x128xf32>
    %118 = arith.addf %116, %117 : vector<1x128xf32>
    %119 = math.rsqrt %118 : vector<1x128xf32>
    %120 = vector.extract_strided_slice %5 {offsets = [0, 384], sizes = [2, 128], strides = [1, 1]} : vector<2x1664xf32> to vector<2x128xf32>
    %121 = vector.extract_strided_slice %5 {offsets = [0, 1152], sizes = [2, 128], strides = [1, 1]} : vector<2x1664xf32> to vector<2x128xf32>
    %122 = vector.broadcast %119 : vector<1x128xf32> to vector<2x128xf32>
    %123 = arith.mulf %120, %122 : vector<2x128xf32>
    %124 = vector.broadcast %107 : vector<1x128xf32> to vector<2x128xf32>
    %125 = arith.mulf %124, %123 : vector<2x128xf32>
    %126 = arith.subf %121, %125 : vector<2x128xf32>
    %127 = vector.shape_cast %103 : vector<128x128xf32> to vector<2x64x128xf32>
    %128 = vector.shape_cast %123 : vector<2x128xf32> to vector<2x1x128xf32>
    %129 = vector.broadcast %128 : vector<2x1x128xf32> to vector<2x64x128xf32>
    %130 = arith.mulf %127, %129 : vector<2x64x128xf32>
    %131 = vector.shape_cast %126 : vector<2x128xf32> to vector<2x1x128xf32>
    %132 = vector.broadcast %131 : vector<2x1x128xf32> to vector<2x64x128xf32>
    %133 = arith.addf %130, %132 : vector<2x64x128xf32>
    %cst_39 = arith.constant 0.000000e+00 : f32
    %134 = vector.broadcast %cst_39 : f32 to vector<2x64x128xf32>
    %135 = arith.maximumf %133, %134 : vector<2x64x128xf32>
    %136 = vector.shape_cast %135 : vector<2x64x128xf32> to vector<128x128xf32>
    %137 = arith.truncf %136 : vector<128x128xf32> to vector<128x128xbf16>
    %c2_40 = arith.constant 2 : index
    %c0_41 = arith.constant 0 : index
    %c0_42 = arith.constant 0 : index
    %138 = vector.load %arg5[%c2_40, %c0_41, %c0_42] : memref<5x128x128xbf16, #tpu.memory_space<vmem>>, vector<1x128x128xbf16>
    %139 = vector.shape_cast %138 : vector<1x128x128xbf16> to vector<128x128xbf16>
    %cst_43 = arith.constant dense<0.000000e+00> : vector<128x128xf32>
    %140 = tpu.matmul %137, %139, %cst_43 {dimension_numbers = #tpu.dot_dimension_numbers<[1], [0], [0], [1], [0, 0, 1, 1], [], []>} : vector<128x128xbf16>, vector<128x128xbf16>, vector<128x128xf32> -> vector<128x128xf32>
    %cst_44 = arith.constant dense<0.000000e+00> : vector<128xf32>
    %141 = vector.multi_reduction <add>, %140, %cst_44 [0] : vector<128x128xf32> to vector<128xf32>
    %142 = vector.shape_cast %141 : vector<128xf32> to vector<1x128xf32>
    %cst_45 = arith.constant 1.280000e+02 : f32
    %143 = vector.broadcast %cst_45 : f32 to vector<1x128xf32>
    %144 = arith.divf %142, %143 : vector<1x128xf32>
    %145 = arith.mulf %140, %140 : vector<128x128xf32>
    %cst_46 = arith.constant dense<0.000000e+00> : vector<128xf32>
    %146 = vector.multi_reduction <add>, %145, %cst_46 [0] : vector<128x128xf32> to vector<128xf32>
    %147 = vector.shape_cast %146 : vector<128xf32> to vector<1x128xf32>
    %cst_47 = arith.constant 1.280000e+02 : f32
    %148 = vector.broadcast %cst_47 : f32 to vector<1x128xf32>
    %149 = arith.divf %147, %148 : vector<1x128xf32>
    %150 = arith.mulf %144, %144 : vector<1x128xf32>
    %151 = arith.subf %149, %150 : vector<1x128xf32>
    %cst_48 = arith.constant 0.000000e+00 : f32
    %152 = vector.broadcast %cst_48 : f32 to vector<1x128xf32>
    %153 = arith.maximumf %151, %152 : vector<1x128xf32>
    %cst_49 = arith.constant 9.99999974E-6 : f32
    %154 = vector.broadcast %cst_49 : f32 to vector<1x128xf32>
    %155 = arith.addf %153, %154 : vector<1x128xf32>
    %156 = math.rsqrt %155 : vector<1x128xf32>
    %157 = vector.extract_strided_slice %5 {offsets = [0, 512], sizes = [2, 128], strides = [1, 1]} : vector<2x1664xf32> to vector<2x128xf32>
    %158 = vector.extract_strided_slice %5 {offsets = [0, 1280], sizes = [2, 128], strides = [1, 1]} : vector<2x1664xf32> to vector<2x128xf32>
    %159 = vector.broadcast %156 : vector<1x128xf32> to vector<2x128xf32>
    %160 = arith.mulf %157, %159 : vector<2x128xf32>
    %161 = vector.broadcast %144 : vector<1x128xf32> to vector<2x128xf32>
    %162 = arith.mulf %161, %160 : vector<2x128xf32>
    %163 = arith.subf %158, %162 : vector<2x128xf32>
    %164 = vector.shape_cast %140 : vector<128x128xf32> to vector<2x64x128xf32>
    %165 = vector.shape_cast %160 : vector<2x128xf32> to vector<2x1x128xf32>
    %166 = vector.broadcast %165 : vector<2x1x128xf32> to vector<2x64x128xf32>
    %167 = arith.mulf %164, %166 : vector<2x64x128xf32>
    %168 = vector.shape_cast %163 : vector<2x128xf32> to vector<2x1x128xf32>
    %169 = vector.broadcast %168 : vector<2x1x128xf32> to vector<2x64x128xf32>
    %170 = arith.addf %167, %169 : vector<2x64x128xf32>
    %cst_50 = arith.constant 0.000000e+00 : f32
    %171 = vector.broadcast %cst_50 : f32 to vector<2x64x128xf32>
    %172 = arith.maximumf %170, %171 : vector<2x64x128xf32>
    %173 = vector.shape_cast %172 : vector<2x64x128xf32> to vector<128x128xf32>
    %174 = arith.truncf %173 : vector<128x128xf32> to vector<128x128xbf16>
    %c3 = arith.constant 3 : index
    %c0_51 = arith.constant 0 : index
    %c0_52 = arith.constant 0 : index
    %175 = vector.load %arg5[%c3, %c0_51, %c0_52] : memref<5x128x128xbf16, #tpu.memory_space<vmem>>, vector<1x128x128xbf16>
    %176 = vector.shape_cast %175 : vector<1x128x128xbf16> to vector<128x128xbf16>
    %cst_53 = arith.constant dense<0.000000e+00> : vector<128x128xf32>
    %177 = tpu.matmul %174, %176, %cst_53 {dimension_numbers = #tpu.dot_dimension_numbers<[1], [0], [0], [1], [0, 0, 1, 1], [], []>} : vector<128x128xbf16>, vector<128x128xbf16>, vector<128x128xf32> -> vector<128x128xf32>
    %cst_54 = arith.constant dense<0.000000e+00> : vector<128xf32>
    %178 = vector.multi_reduction <add>, %177, %cst_54 [0] : vector<128x128xf32> to vector<128xf32>
    %179 = vector.shape_cast %178 : vector<128xf32> to vector<1x128xf32>
    %cst_55 = arith.constant 1.280000e+02 : f32
    %180 = vector.broadcast %cst_55 : f32 to vector<1x128xf32>
    %181 = arith.divf %179, %180 : vector<1x128xf32>
    %182 = arith.mulf %177, %177 : vector<128x128xf32>
    %cst_56 = arith.constant dense<0.000000e+00> : vector<128xf32>
    %183 = vector.multi_reduction <add>, %182, %cst_56 [0] : vector<128x128xf32> to vector<128xf32>
    %184 = vector.shape_cast %183 : vector<128xf32> to vector<1x128xf32>
    %cst_57 = arith.constant 1.280000e+02 : f32
    %185 = vector.broadcast %cst_57 : f32 to vector<1x128xf32>
    %186 = arith.divf %184, %185 : vector<1x128xf32>
    %187 = arith.mulf %181, %181 : vector<1x128xf32>
    %188 = arith.subf %186, %187 : vector<1x128xf32>
    %cst_58 = arith.constant 0.000000e+00 : f32
    %189 = vector.broadcast %cst_58 : f32 to vector<1x128xf32>
    %190 = arith.maximumf %188, %189 : vector<1x128xf32>
    %cst_59 = arith.constant 9.99999974E-6 : f32
    %191 = vector.broadcast %cst_59 : f32 to vector<1x128xf32>
    %192 = arith.addf %190, %191 : vector<1x128xf32>
    %193 = math.rsqrt %192 : vector<1x128xf32>
    %194 = vector.extract_strided_slice %5 {offsets = [0, 640], sizes = [2, 128], strides = [1, 1]} : vector<2x1664xf32> to vector<2x128xf32>
    %195 = vector.extract_strided_slice %5 {offsets = [0, 1408], sizes = [2, 128], strides = [1, 1]} : vector<2x1664xf32> to vector<2x128xf32>
    %196 = vector.broadcast %193 : vector<1x128xf32> to vector<2x128xf32>
    %197 = arith.mulf %194, %196 : vector<2x128xf32>
    %198 = vector.broadcast %181 : vector<1x128xf32> to vector<2x128xf32>
    %199 = arith.mulf %198, %197 : vector<2x128xf32>
    %200 = arith.subf %195, %199 : vector<2x128xf32>
    %201 = vector.shape_cast %177 : vector<128x128xf32> to vector<2x64x128xf32>
    %202 = vector.shape_cast %197 : vector<2x128xf32> to vector<2x1x128xf32>
    %203 = vector.broadcast %202 : vector<2x1x128xf32> to vector<2x64x128xf32>
    %204 = arith.mulf %201, %203 : vector<2x64x128xf32>
    %205 = vector.shape_cast %200 : vector<2x128xf32> to vector<2x1x128xf32>
    %206 = vector.broadcast %205 : vector<2x1x128xf32> to vector<2x64x128xf32>
    %207 = arith.addf %204, %206 : vector<2x64x128xf32>
    %cst_60 = arith.constant 0.000000e+00 : f32
    %208 = vector.broadcast %cst_60 : f32 to vector<2x64x128xf32>
    %209 = arith.maximumf %207, %208 : vector<2x64x128xf32>
    %210 = vector.shape_cast %209 : vector<2x64x128xf32> to vector<128x128xf32>
    %211 = arith.truncf %210 : vector<128x128xf32> to vector<128x128xbf16>
    %c4 = arith.constant 4 : index
    %c0_61 = arith.constant 0 : index
    %c0_62 = arith.constant 0 : index
    %212 = vector.load %arg5[%c4, %c0_61, %c0_62] : memref<5x128x128xbf16, #tpu.memory_space<vmem>>, vector<1x128x128xbf16>
    %213 = vector.shape_cast %212 : vector<1x128x128xbf16> to vector<128x128xbf16>
    %cst_63 = arith.constant dense<0.000000e+00> : vector<128x128xf32>
    %214 = tpu.matmul %211, %213, %cst_63 {dimension_numbers = #tpu.dot_dimension_numbers<[1], [0], [0], [1], [0, 0, 1, 1], [], []>} : vector<128x128xbf16>, vector<128x128xbf16>, vector<128x128xf32> -> vector<128x128xf32>
    %cst_64 = arith.constant dense<0.000000e+00> : vector<128xf32>
    %215 = vector.multi_reduction <add>, %214, %cst_64 [0] : vector<128x128xf32> to vector<128xf32>
    %216 = vector.shape_cast %215 : vector<128xf32> to vector<1x128xf32>
    %cst_65 = arith.constant 1.280000e+02 : f32
    %217 = vector.broadcast %cst_65 : f32 to vector<1x128xf32>
    %218 = arith.divf %216, %217 : vector<1x128xf32>
    %219 = arith.mulf %214, %214 : vector<128x128xf32>
    %cst_66 = arith.constant dense<0.000000e+00> : vector<128xf32>
    %220 = vector.multi_reduction <add>, %219, %cst_66 [0] : vector<128x128xf32> to vector<128xf32>
    %221 = vector.shape_cast %220 : vector<128xf32> to vector<1x128xf32>
    %cst_67 = arith.constant 1.280000e+02 : f32
    %222 = vector.broadcast %cst_67 : f32 to vector<1x128xf32>
    %223 = arith.divf %221, %222 : vector<1x128xf32>
    %224 = arith.mulf %218, %218 : vector<1x128xf32>
    %225 = arith.subf %223, %224 : vector<1x128xf32>
    %cst_68 = arith.constant 0.000000e+00 : f32
    %226 = vector.broadcast %cst_68 : f32 to vector<1x128xf32>
    %227 = arith.maximumf %225, %226 : vector<1x128xf32>
    %cst_69 = arith.constant 9.99999974E-6 : f32
    %228 = vector.broadcast %cst_69 : f32 to vector<1x128xf32>
    %229 = arith.addf %227, %228 : vector<1x128xf32>
    %230 = math.rsqrt %229 : vector<1x128xf32>
    %231 = vector.extract_strided_slice %5 {offsets = [0, 768], sizes = [2, 128], strides = [1, 1]} : vector<2x1664xf32> to vector<2x128xf32>
    %232 = vector.extract_strided_slice %5 {offsets = [0, 1536], sizes = [2, 128], strides = [1, 1]} : vector<2x1664xf32> to vector<2x128xf32>
    %233 = vector.broadcast %230 : vector<1x128xf32> to vector<2x128xf32>
    %234 = arith.mulf %231, %233 : vector<2x128xf32>
    %235 = vector.broadcast %218 : vector<1x128xf32> to vector<2x128xf32>
    %236 = arith.mulf %235, %234 : vector<2x128xf32>
    %237 = arith.subf %232, %236 : vector<2x128xf32>
    %238 = vector.shape_cast %214 : vector<128x128xf32> to vector<2x64x128xf32>
    %239 = vector.shape_cast %234 : vector<2x128xf32> to vector<2x1x128xf32>
    %240 = vector.broadcast %239 : vector<2x1x128xf32> to vector<2x64x128xf32>
    %241 = arith.mulf %238, %240 : vector<2x64x128xf32>
    %242 = vector.shape_cast %237 : vector<2x128xf32> to vector<2x1x128xf32>
    %243 = vector.broadcast %242 : vector<2x1x128xf32> to vector<2x64x128xf32>
    %244 = arith.addf %241, %243 : vector<2x64x128xf32>
    %cst_70 = arith.constant 0.000000e+00 : f32
    %245 = vector.broadcast %cst_70 : f32 to vector<2x64x128xf32>
    %246 = arith.maximumf %244, %245 : vector<2x64x128xf32>
    %247 = vector.shape_cast %246 : vector<2x64x128xf32> to vector<128x128xf32>
    %c0_71 = arith.constant 0 : index
    %c0_72 = arith.constant 0 : index
    %248 = vector.load %arg6[%c0_71, %c0_72] : memref<1x128xf32, #tpu.memory_space<vmem>>, vector<1x128xf32>
    %249 = tpu.transpose %247, [1, 0] : vector<128x128xf32> -> vector<128x128xf32>
    %cst_73 = arith.constant dense<0.000000e+00> : vector<1x128xf32>
    %250 = tpu.matmul %248, %249, %cst_73 {dimension_numbers = #tpu.dot_dimension_numbers<[1], [0], [0], [1], [0, 0, 1, 1], [], []>} : vector<1x128xf32>, vector<128x128xf32>, vector<1x128xf32> -> vector<1x128xf32>
    %c0_74 = arith.constant 0 : index
    %c0_75 = arith.constant 0 : index
    %251 = vector.load %arg7[%c0_74, %c0_75] : memref<1x1xf32, #tpu.memory_space<vmem>>, vector<1x1xf32>
    %252 = vector.broadcast %251 : vector<1x1xf32> to vector<1x128xf32>
    %253 = arith.addf %250, %252 : vector<1x128xf32>
    %c0_76 = arith.constant 0 : index
    %c0_77 = arith.constant 0 : index
    %254 = vector.load %arg8[%c0_76, %c0_77] : memref<1x128xf32, #tpu.memory_space<vmem>>, vector<1x128xf32>
    tpu.vector_store %arg8[%c0_76, %c0_77], %253 {strides = array<i32>} : memref<1x128xf32, #tpu.memory_space<vmem>>, vector<1x128xf32>,
    return
  }
}

</mosaic_0001>

<bundles_post_ra>
// kernel: decoder_forward.1
= control target key start
LH: loop header
LB: loop body
LE: loop exit
PB: predicated region body
PF: predicated region fallthrough
CT: control target
= control target key end

     0   :  { %s4699_s0 = inlined_call_operand.vmem [shape: f32[128,3], index: 0, kind: input, shape index: {}]   ;;  %s4700_s1 = inlined_call_operand.vmem [shape: f32[2,32], index: 1, kind: input, shape index: {}]   ;;  %s4701_s2 = inlined_call_operand.vmem [shape: f32[3,128], index: 2, kind: input, shape index: {}]   ;;  %s4702_s3 = inlined_call_operand.hbm [shape: f32[32,1664], index: 3, kind: input, shape index: {}]   ;;  %s4703_s4 = inlined_call_operand.vmem [shape: f32[1,1664], index: 4, kind: input, shape index: {}]   ;;  %s4704_s5 = inlined_call_operand.hbm [shape: bf16[5,128,128], index: 5, kind: input, shape index: {}]   ;;  %s4705_s6 = inlined_call_operand.vmem [shape: f32[1,128], index: 6, kind: input, shape index: {}]   ;;  %s4706_s7 = inlined_call_operand.<no memory space> [shape: f32[1,1], index: 7, kind: input, shape index: {}]   ;;  %s4707_s8 = inlined_call_operand.vmem [shape: f32[1,128], index: 8, kind: output, shape index: {}]  }
   0x1   :  { %v13_v0 = vstv %s4706_s7 }
   0x2   :  { %14 = vst [vmem:[#allocation2] sm:$0x1] %v13_v0 }
   0x3   :  { %15 = vsyncpa [#allocation4], 0 }
   0x4   :  { %16 = vsyncpa [#allocation6], 0  ;;  %s3582_s29 = smov [#allocation3]  }
   0x5   :  { %s28_s30 = sshll.u32 %s3582_s29, 4  ;;  %s29_s30 = int_to_ptr.vmem [resolvable:$true] %s28_s30 }
   0x6   :  { %s3546_s9 = scalar_lea.vmem %s29_s30, 6656  ;;  %p3551_p1 = scmp.lt.s32.totalorder %s29_s30, %s29_s30 }
   0x7   :  { %p3547_p0 = scmp.ne.s32.totalorder %s29_s30, %s3546_s9  ;;  %p3552_p2 = scmp.lt.s32.totalorder %s3546_s9, %s3546_s9 }
   0x9   :  { %p3553_p3 = por %p3552_p2, %p3551_p1 }
   0xb   :  { %p3554_p4 = pnand %p3553_p3, %p3547_p0 }
   0xd   :  { %3557 = shalt.err (!%p3554_p4)
}
   0xe   :  { %s3583_s10 = smov 1664   ;;  %s3584_s11 = smov 104  }
   0xf   :  { %34 = dma.hbm_to_vmem [thread:$0]  %s4702_s3, 6656, %s29_s30, [#allocation4], %s3583_s10, %s3583_s10, %s3584_s11  }
  0x10   :  { %s3585_s7 = smov [#allocation5]  }
  0x11   :  { %s42_s14 = sshll.u32 %s3585_s7, 4  ;;  %s43_s14 = int_to_ptr.vmem [resolvable:$true] %s42_s14 }
  0x12   :  { %s3566_s15 = scalar_lea.vmem %s43_s14, 5120  ;;  %p3571_p6 = scmp.lt.s32.totalorder %s43_s14, %s43_s14 }
  0x13   :  { %p3567_p5 = scmp.ne.s32.totalorder %s43_s14, %s3566_s15  ;;  %p3572_p7 = scmp.lt.s32.totalorder %s3566_s15, %s3566_s15 }
  0x15   :  { %p3573_p8 = por %p3572_p7, %p3571_p6 }
  0x17   :  { %p3574_p9 = pnand %p3573_p8, %p3567_p5 }
  0x19   :  { %3577 = shalt.err (!%p3574_p9)
}
  0x1a   :  { %s3586_s16 = smov 64   ;;  %s3587_s17 = smov 4  }
  0x1b   :  { %48 = dma.hbm_to_vmem [thread:$0]  %s4704_s5, 5120, %s43_s14, [#allocation6], %s3586_s16, %s3586_s16, %s3587_s17  }
  0x1c   :  { %3578 = dma.done.wait [#allocation4], 6656  }
  0x1d   :  { %3579 = vsyncadd [#allocation4], 4294960640 }
  0x1e   :  { %3580 = dma.done.wait [#allocation6], 5120  }
  0x1f   :  { %3581 = vsyncadd [#allocation6], 4294962176  ;;  %v3588_v1 = vmov 2   ;;  %v3589_v2 = vmov 1   ;;  %v3590_v3 = vmov 0.0   ;;  %v3655_v4 = vld [vmem:[%s4699_s0] sm:$0xff] }
  0x20   :  { %3451 = vset.pattern.permute.xlu0 %v3588_v1  ;;  %3450 = vset.pattern.permute.xlu1 %v3589_v2  ;;  %v101_v5 = vld [vmem:[#allocation3 + $0x140] sm:$0xff]  ;;  %v100_v6 = vld [vmem:[#allocation3 + $0x138] sm:$0xff]  ;;  %v87_v8 = vld [vmem:[#allocation3 + $0xd0] sm:$0xff]  ;;  %vm182_vm0 = vcmask 261120   ;;  %v3591_v33 = vmov 0   ;;  %vm3593_vm1 = vmmov 0  }
  0x21   :  { %250 = vmatprep.mubr.f32.mxu1 %v3590_v3  ;;  %392 = vmatprep.mubr.f32.mxu0 %v3590_v3  ;;  %v88_v7 = vld [vmem:[#allocation3 + $0xd8] sm:$0xff]  ;;  %v3662_v9 = vld [vmem:[%s4699_s0 + $0x28] sm:$0xff]  ;;  %v75_v11 = vld [vmem:[#allocation3 + $0x70] sm:$0xff] }
  0x22   :  { %902 = vperm.xlu0 %3451, %v3655_v4   ;;  %801 = vperm.xlu1 %3450, %v3655_v4   ;;  %v3667_v10 = vld [vmem:[%s4699_s0 + $0x8] sm:$0xff]  ;;  %v3674_v15 = vld [vmem:[%s4699_s0 + $0x30] sm:$0xff]  ;;  %v3684_v17 = vld [vmem:[%s4700_s1] sm:$0x3] }
  0x23   :  { %210 = vmatprep.subr.mxu1 %v101_v5  ;;  %v74_v12 = vld [vmem:[#allocation3 + $0x68] sm:$0xff]  ;;  %v61_v14 = vld [vmem:[#allocation3] sm:$0xff]  ;;  %v103_v18 = vld [vmem:[#allocation3 + $0x150] sm:$0xff] }
  0x24   :  { %211 = vmatpush1.msra.mxu1 %v100_v6  ;;  %v62_v13 = vld [vmem:[#allocation3 + $0x8] sm:$0xff]  ;;  %v89_v22 = vld [vmem:[#allocation3 + $0xe0] sm:$0xff]  ;;  %v3700_v24 = vld [vmem:[%s4699_s0 + $0x58] sm:$0xff] }
  0x25   :  { %212 = vmatprep.subr.mxu1 %v88_v7  ;;  %v3679_v16 = vld [vmem:[%s4699_s0 + $0x10] sm:$0xff]  ;;  %v77_v23 = vld [vmem:[#allocation3 + $0x80] sm:$0xff]  ;;  %v76_v25 = vld [vmem:[#allocation3 + $0x78] sm:$0xff] }
  0x26   :  { %213 = vmatpush1.msra.mxu1 %v87_v8  ;;  %922 = vperm.xlu0 %3451, %v3662_v9   ;;  %v102_v19 = vld [vmem:[#allocation3 + $0x148] sm:$0xff]  ;;  %v64_v26 = vld [vmem:[#allocation3 + $0x18] sm:$0xff]  ;;  %v63_v27 = vld [vmem:[#allocation3 + $0x10] sm:$0xff] }
  0x27   :  { %805 = vperm.xlu1 %3450, %v3667_v10   ;;  %214 = vmatprep.subr.mxu1 %v75_v11  ;;  %v3693_v20 = vld [vmem:[%s4699_s0 + $0x50] sm:$0xff]  ;;  %v685_v29 = vld [vmem:[%s4699_s0 + $0x18] sm:$0xff]  ;;  %v93_v32 = vld [vmem:[#allocation3 + $0x100] sm:$0xff] }
  0x28   :  { %215 = vmatpush1.msra.mxu1 %v74_v12  ;;  %v90_v21 = vld [vmem:[#allocation3 + $0xe8] sm:$0xff]  ;;  %v107_v28 = vld [vmem:[#allocation3 + $0x170] sm:$0xff]  ;;  %v81_v34 = vld [vmem:[#allocation3 + $0xa0] sm:$0xff] }
  0x29   :  { %216 = vmatprep.subr.mxu1 %v62_v13  ;;  %v106_v30 = vld [vmem:[#allocation3 + $0x168] sm:$0xff]  ;;  %v80_v35 = vld [vmem:[#allocation3 + $0x98] sm:$0xff]  ;;  %v67_v38 = vld [vmem:[#allocation3 + $0x30] sm:$0xff] }
  0x2a   :  { %217 = vmatpush1.msra.mxu1 %v61_v14  ;;  %926 = vperm.xlu0 %3451, %v3674_v15   ;;  %v94_v31 = vld [vmem:[#allocation3 + $0x108] sm:$0xff]  ;;  %v686_v36 = vld [vmem:[%s4699_s0 + $0x20] sm:$0xff]  ;;  %v689_v43 = vld [vmem:[%s4699_s0 + $0x38] sm:$0xff] }
  0x2b   :  { %809 = vperm.xlu1 %3450, %v3679_v16   ;;  %3080 = vmatmul.mubr.msk.f32.vlgmr.msra.gmra.mxu1 %vm182_vm0, %v3684_v17  ;;  %v68_v37 = vld [vmem:[#allocation3 + $0x38] sm:$0xff]  ;;  %v691_v40 = vld [vmem:[%s4699_s0 + $0x48] sm:$0xff]  ;;  %v696_v42 = vld [vmem:[%s4699_s0 + $0x70] sm:$0xff] }
  0x2c   :  { %281 = vmatprep.subr.mxu1 %v103_v18  ;;  %321 = vmatprep.mubr.f32.mxu1 %v3590_v3  ;;  %v690_v39 = vld [vmem:[%s4699_s0 + $0x40] sm:$0xff]  ;;  %v695_v41 = vld [vmem:[%s4699_s0 + $0x68] sm:$0xff]  ;;  %v697_v44 = vld [vmem:[%s4699_s0 + $0x78] sm:$0xff] }
  0x2d   :  { %282 = vmatpush1.msra.mxu1 %v102_v19  ;;  %v694_v45 = vld [vmem:[%s4699_s0 + $0x60] sm:$0xff]  ;;  %v111_v57 = vld [vmem:[#allocation3 + $0x190] sm:$0xff]  ;;  %v110_v58 = vld [vmem:[#allocation3 + $0x188] sm:$0xff] }
  0x2e   :  { %942 = vperm.xlu0 %3451, %v3693_v20   ;;  %283 = vmatprep.subr.mxu1 %v90_v21  ;;  %v98_v59 = vld [vmem:[#allocation3 + $0x128] sm:$0xff]  ;;  %v97_v60 = vld [vmem:[#allocation3 + $0x120] sm:$0xff]  ;;  %v84_v63 = vld [vmem:[#allocation3 + $0xb8] sm:$0xff] }
  0x2f   :  { %3452 = vset.pattern.permute.xlu1 %v3588_v1  ;;  %284 = vmatpush1.msra.mxu1 %v89_v22  ;;  %v85_v61 = vld [vmem:[#allocation3 + $0xc0] sm:$0xff]  ;;  %v3483_v5 = vld [vmem:[#allocation5 + $0x30] sm:$0xff]   ;;  %v3484_v8 = vld [vmem:[#allocation5 + $0x28] sm:$0xff]  }
  0x30   :  { %906 = vperm.xlu1 %3452, %v3667_v10   ;;  %285 = vmatprep.subr.mxu1 %v77_v23  ;;  %v3820_v18 = vld [vmem:[%s4701_s2 + $0x1] ss:$0 sm:$0xff]  ;;  %v3825_v19 = vld [vmem:[%s4701_s2 + $0x2] ss:$0 sm:$0xff] }
  0x31   :  { %286 = vmatpush1.msra.mxu1 %v76_v25 }
  0x32   :  { %946 = vperm.xlu0 %3451, %v3700_v24   ;;  %287 = vmatprep.subr.mxu1 %v64_v26 }
  0x33   :  { %288 = vmatpush1.msra.mxu1 %v63_v27 }
  0x34   :  { %3453 = vset.pattern.permute.xlu1 %v3591_v33  ;;  %423 = vmatprep.subr.mxu1 %v107_v28 }
  0x35   :  { %716 = vperm.xlu1 %3453, %v685_v29   ;;  %3081 = vmatmul.mubr.msk.f32.vlgmr.msra.gmra.mxu1 %vm182_vm0, %v3684_v17 }
  0x36   :  { %3471 = vset.pattern.permute.xlu0 %v3589_v2  ;;  %424 = vmatpush1.msra.mxu1 %v106_v30 }
  0x37   :  { %813 = vperm.xlu0 %3471, %v685_v29   ;;  %425 = vmatprep.subr.mxu1 %v94_v31  ;;  %v3485_v31 = vld [vmem:[#allocation5 + $0x20] sm:$0xff]  }
  0x38   :  { %426 = vmatpush1.msra.mxu1 %v93_v32  ;;  %463 = vmatprep.mubr.f32.mxu1 %v3590_v3 }
  0x39   :  { %3454 = vset.pattern.permute.xlu1 %v3588_v1  ;;  %427 = vmatprep.subr.mxu1 %v81_v34 }
  0x3a   :  { %910 = vperm.xlu1 %3454, %v3679_v16   ;;  %428 = vmatpush1.msra.mxu1 %v80_v35 }
  0x3b   :  { %817 = vperm.xlu0 %3471, %v686_v36   ;;  %429 = vmatprep.subr.mxu1 %v68_v37  ;;  %v117_v37 = vlaneseq }
  0x3c   :  { %430 = vmatpush1.msra.mxu1 %v67_v38  ;;  %v3487_v38 = vld [vmem:[#allocation5 + $0x10] sm:$0xff]  }
  0x3d   :  { %3083 = vmatmul.mubr.msk.f32.vlgmr.msra.gmra.mxu1 %vm182_vm0, %v3684_v17  ;;  %565 = vmatprep.subr.mxu1 %v111_v57 }
  0x3e   :  { %3455 = vset.pattern.permute.xlu1 %v3591_v33  ;;  %605 = vmatprep.mubr.f32.mxu1 %v3590_v3 }
  0x3f   :  { %721 = vperm.xlu1 %3455, %v686_v36   ;;  %833 = vperm.xlu0 %3471, %v690_v39  }
  0x40   :  { %566 = vmatpush1.msra.mxu1 %v110_v58 }
  0x41   :  { %567 = vmatprep.subr.mxu1 %v98_v59 }
  0x42   :  { %568 = vmatpush1.msra.mxu1 %v97_v60 }
  0x43   :  { %3456 = vset.pattern.permute.xlu1 %v3588_v1  ;;  %837 = vperm.xlu0 %3471, %v691_v40  }
  0x44   :  { %914 = vperm.xlu1 %3456, %v685_v29   ;;  %569 = vmatprep.subr.mxu1 %v85_v61 }
  0x45   :  { %570 = vmatpush1.msra.mxu1 %v84_v63 }
  0x47   :  { %853 = vperm.xlu0 %3471, %v695_v41  }
  0x48   :  { %3457 = vset.pattern.permute.xlu1 %v3589_v2 }
  0x49   :  { %821 = vperm.xlu1 %3457, %v3662_v9  }
  0x4b   :  { %857 = vperm.xlu0 %3471, %v696_v42  }
  0x4d   :  { %3458 = vset.pattern.permute.xlu1 %v3588_v1 }
  0x4e   :  { %918 = vperm.xlu1 %3458, %v686_v36   ;;  %v3486_v36 = vld [vmem:[#allocation5 + $0x18] sm:$0xff]  }
  0x4f   :  { %3475 = vset.pattern.permute.xlu0 %v3591_v33 }
  0x50   :  { %701 = vperm.xlu0 %3475, %v3655_v4   ;;  %v3482_v4 = vld [vmem:[#allocation5 + $0x38] sm:$0xff]  }
  0x52   :  { %3459 = vset.pattern.permute.xlu1 %v3589_v2 }
  0x53   :  { %825 = vperm.xlu1 %3459, %v3674_v15  }
  0x54   :  { %706 = vperm.xlu0 %3475, %v3667_v10  }
  0x57   :  { %3460 = vset.pattern.permute.xlu1 %v3591_v33 }
  0x58   :  { %736 = vperm.xlu1 %3460, %v689_v43   ;;  %711 = vperm.xlu0 %3475, %v3679_v16  }
  0x5c   :  { %3461 = vset.pattern.permute.xlu1 %v3589_v2  ;;  %726 = vperm.xlu0 %3475, %v3662_v9  }
  0x5d   :  { %829 = vperm.xlu1 %3461, %v689_v43  }
  0x60   :  { %731 = vperm.xlu0 %3475, %v3674_v15  }
  0x61   :  { %3462 = vset.pattern.permute.xlu1 %v3591_v33 }
  0x62   :  { %741 = vperm.xlu1 %3462, %v690_v39  }
  0x64   :  { %751 = vperm.xlu0 %3475, %v3693_v20  }
  0x66   :  { %3463 = vset.pattern.permute.xlu1 %v3588_v1 }
  0x67   :  { %930 = vperm.xlu1 %3463, %v689_v43  }
  0x68   :  { %756 = vperm.xlu0 %3475, %v3700_v24  }
  0x6b   :  { %3464 = vset.pattern.permute.xlu1 %v3591_v33 }
  0x6c   :  { %746 = vperm.xlu1 %3464, %v691_v40   ;;  %776 = vperm.xlu0 %3475, %v697_v44  }
  0x70   :  { %3465 = vset.pattern.permute.xlu1 %v3588_v1  ;;  %3479 = vset.pattern.permute.xlu0 %v3588_v1 }
  0x71   :  { %934 = vperm.xlu1 %3465, %v690_v39   ;;  %962 = vperm.xlu0 %3479, %v697_v44  }
  0x75   :  { %3466 = vset.pattern.permute.xlu1 %v3589_v2  ;;  %3481 = vset.pattern.permute.xlu0 %v3591_v33 }
  0x76   :  { %841 = vperm.xlu1 %3466, %v3693_v20   ;;  %v3830_v20 = vld [vmem:[%s4701_s2] ss:$0 sm:$0xff] }
  0x7a   :  { %3467 = vset.pattern.permute.xlu1 %v3588_v1 }
  0x7b   :  { %938 = vperm.xlu1 %3467, %v691_v40   ;;  %v3488_v40 = vld [vmem:[#allocation5 + $0x8] sm:$0xff]  }
  0x7f   :  { %3468 = vset.pattern.permute.xlu1 %v3589_v2 }
  0x80   :  { %845 = vperm.xlu1 %3468, %v3700_v24  }
  0x84   :  { %3469 = vset.pattern.permute.xlu1 %v3591_v33 }
  0x85   :  { %761 = vperm.xlu1 %3469, %v694_v45  }
  0x89   :  { %3470 = vset.pattern.permute.xlu1 %v3589_v2 }
  0x8a   :  { %849 = vperm.xlu1 %3470, %v694_v45  }
  0x8e   :  { %3472 = vset.pattern.permute.xlu1 %v3591_v33 }
  0x8f   :  { %766 = vperm.xlu1 %3472, %v695_v41  }
  0x93   :  { %3473 = vset.pattern.permute.xlu1 %v3588_v1 }
  0x94   :  { %950 = vperm.xlu1 %3473, %v694_v45  }
  0x98   :  { %3474 = vset.pattern.permute.xlu1 %v3591_v33 }
  0x99   :  { %771 = vperm.xlu1 %3474, %v696_v42  }
  0x9d   :  { %3476 = vset.pattern.permute.xlu1 %v3588_v1  ;;  %v3776_v46 = vpop.permute.xlu1 %801  ;;  %v3778_v47 = vpop.permute.xlu0 %902 }
  0x9e   :  { %954 = vperm.xlu1 %3476, %v695_v41   ;;  %v3844_v41 = vshrl.u32 %v117_v37, 7  ;;  %v104_v37 = vld [vmem:[#allocation3 + $0x158] sm:$0xff] }
  0xa1   :  { %v3780_v48 = vpop.permute.xlu0 %922 }
  0xa2   :  { %3477 = vset.pattern.permute.xlu1 %v3589_v2  ;;  %v806_v49 = vpop.permute.xlu1 %805  ;;  %v71_v2 = vld [vmem:[#allocation3 + $0x50] sm:$0xff] }
  0xa3   :  { %861 = vperm.xlu1 %3477, %v697_v44   ;;  %v869_v22 = vmul.f32 %v3820_v18, %v806_v49  ;;  %v3592_v44 = vmov 1966171168   ;;  %v3849_v49 = vsub.s32 0, %v3844_v41 }
  0xa4   :  { %v1003_v45 = vunpack.c.l.s4 %v3592_v44 }
  0xa5   :  { %v3783_v50 = vpop.permute.xlu0 %926 }
  0xa6   :  { %v810_v51 = vpop.permute.xlu1 %809 }
  0xa7   :  { %3478 = vset.pattern.permute.xlu1 %v3588_v1  ;;  %v72_v1 = vld [vmem:[#allocation3 + $0x58] sm:$0xff]  ;;  %v870_v28 = vmul.f32 %v3820_v18, %v810_v51 }
  0xa8   :  { %958 = vperm.xlu1 %3478, %v696_v42   ;;  %571 = vmatprep.subr.mxu1 %v72_v1  ;;  %v3489_v42 = vld [vmem:[#allocation5] sm:$0xff]   ;;  %v868_v1 = vmul.f32 %v3820_v18, %v3776_v46 }
  0xa9   :  { %v3786_v52 = vpop.permute.xlu0 %942  ;;  %572 = vmatpush1.msra.mxu1 %v71_v2  ;;  %v3854_v51 = vld [vmem:[%s4703_s4] sm:$0xff] }
  0xaa   :  { %3085 = vmatmul.mubr.msk.f32.vlgmr.msra.gmra.mxu1 %vm182_vm0, %v3684_v17  ;;  %3243 = vmatprep.subr.bf16.mxu1 %v3482_v4  ;;  %v120_v58 = vrot.slane %v3854_v51, %v3849_v49 }
  0xab   :  { %v907_v53 = vpop.permute.xlu1 %906  ;;  %3244 = vmatpush3.bf16.msra.mxu1 %v3482_v4  ;;  %v969_v4 = vmul.f32 %v3825_v19, %v3778_v47 }
  0xac   :  { %3480 = vset.pattern.permute.xlu1 %v3591_v33  ;;  %3245 = vmatprep.subr.bf16.mxu1 %v3483_v5  ;;  %v970_v24 = vmul.f32 %v3825_v19, %v907_v53  ;;  %v1004_v53 = vunpack.c.0.s8 %v1003_v45 }
  0xad   :  { %v3789_v54 = vpop.permute.xlu0 %946 }
  0xae   :  { %v3861_v59 = vsub.s32 %v1004_v53, %v3844_v41  ;;  %v91_v53 = vld [vmem:[#allocation3 + $0xf0] sm:$0xff] }
  0xaf   :  { %3246 = vmatpush3.bf16.msra.mxu1 %v3483_v5 }
  0xb0   :  { %v3791_v55 = vpop.permute.xlu1 %716  ;;  %3247 = vmatprep.subr.bf16.mxu1 %v3484_v8 }
  0xb2   :  { %v3793_v56 = vpop.permute.xlu0 %813 }
  0xb3   :  { %3248 = vmatpush3.bf16.msra.mxu1 %v3484_v8  ;;  %v871_v47 = vmul.f32 %v3820_v18, %v3793_v56 }
  0xb4   :  { %3249 = vmatprep.subr.bf16.mxu1 %v3485_v31 }
  0xb5   :  { %v911_v62 = vpop.permute.xlu1 %910 }
  0xb6   :  { %v3795_v0 = vpop.permute.xlu0 %817  ;;  %v971_v32 = vmul.f32 %v3825_v19, %v911_v62 }
  0xb7   :  { %3250 = vmatpush3.bf16.msra.mxu1 %v3485_v31  ;;  %v872_v56 = vmul.f32 %v3820_v18, %v3795_v0 }
  0xb8   :  { %3251 = vmatprep.subr.bf16.mxu1 %v3486_v36 }
  0xba   :  { %v3797_v6 = vpop.permute.xlu1 %721  ;;  %v3799_v7 = vpop.permute.xlu0 %833 }
  0xbb   :  { %3252 = vmatpush3.bf16.msra.mxu1 %v3486_v36  ;;  %v105_v36 = vld [vmem:[#allocation3 + $0x160] sm:$0xff] }
  0xbc   :  { %3253 = vmatprep.subr.bf16.mxu1 %v3487_v38  ;;  %352 = vmatprep.subr.mxu0 %v105_v36 }
  0xbd   :  { %353 = vmatpush1.msra.mxu0 %v104_v37 }
  0xbe   :  { %v3803_v9 = vpop.permute.xlu0 %837 }
  0xbf   :  { %v3805_v10 = vpop.permute.xlu1 %914  ;;  %3254 = vmatpush3.bf16.msra.mxu1 %v3487_v38  ;;  %v92_v38 = vld [vmem:[#allocation3 + $0xf8] sm:$0xff] }
  0xc0   :  { %3255 = vmatprep.subr.bf16.mxu1 %v3488_v40  ;;  %354 = vmatprep.subr.mxu0 %v92_v38 }
  0xc1   :  { %355 = vmatpush1.msra.mxu0 %v91_v53 }
  0xc2   :  { %v3807_v11 = vpop.permute.xlu0 %853 }
  0xc3   :  { %3256 = vmatpush3.bf16.msra.mxu1 %v3488_v40 }
  0xc4   :  { %v3809_v12 = vpop.permute.xlu1 %821  ;;  %3257 = vmatprep.subr.bf16.mxu1 %v3489_v42 }
  0xc6   :  { %v3811_v13 = vpop.permute.xlu0 %857 }
  0xc7   :  { %3258 = vmatpush3.bf16.msra.mxu1 %v3489_v42 }
  0xc9   :  { %v3813_v14 = vpop.permute.xlu1 %918 }
  0xca   :  { %v973_v42 = vmul.f32 %v3825_v19, %v3813_v14 }
  0xcb   :  { %v702_v15 = vpop.permute.xlu0 %701 }
  0xcc   :  { %v783_v61 = vmul.f32 %v3830_v20, %v702_v15 }
  0xce   :  { %v3815_v16 = vpop.permute.xlu1 %825  ;;  %v884_v5 = vadd.f32 %v868_v1, %v783_v61  ;;  %v78_v1 = vld [vmem:[#allocation3 + $0x88] sm:$0xff] }
  0xcf   :  { %v707_v21 = vpop.permute.xlu0 %706 }
  0xd0   :  { %v784_v23 = vmul.f32 %v3830_v20, %v707_v21 }
  0xd2   :  { %v885_v25 = vadd.f32 %v869_v22, %v784_v23  ;;  %v985_v22 = vadd.f32 %v969_v4, %v884_v5  ;;  %v66_v4 = vld [vmem:[#allocation3 + $0x28] sm:$0xff] }
  0xd3   :  { %v3835_v26 = vpop.permute.xlu1 %736  ;;  %v712_v27 = vpop.permute.xlu0 %711 }
  0xd4   :  { %v986_v29 = vadd.f32 %v970_v24, %v885_v25  ;;  %v785_v30 = vmul.f32 %v3830_v20, %v712_v27  ;;  %v786_v27 = vmul.f32 %v3830_v20, %v3791_v55  ;;  %v787_v55 = vmul.f32 %v3830_v20, %v3797_v6  ;;  %v79_v6 = vld [vmem:[#allocation3 + $0x90] sm:$0xff] }
  0xd5   :  { %356 = vmatprep.subr.mxu0 %v79_v6 }
  0xd6   :  { %v886_v33 = vadd.f32 %v870_v28, %v785_v30  ;;  %v972_v28 = vmul.f32 %v3825_v19, %v3805_v10  ;;  %357 = vmatpush1.msra.mxu0 %v78_v1 }
  0xd7   :  { %v727_v25 = vpop.permute.xlu0 %726  ;;  %358 = vmatprep.subr.mxu0 %v66_v4  ;;  %v69_v4 = vld [vmem:[#allocation3 + $0x40] sm:$0xff] }
  0xd8   :  { %v987_v34 = vadd.f32 %v971_v32, %v886_v33  ;;  %v3840_v35 = vpop.permute.xlu1 %829  ;;  %v887_v33 = vadd.f32 %v871_v47, %v786_v27  ;;  %v788_v44 = vmul.f32 %v3830_v20, %v727_v25  ;;  %v65_v25 = vld [vmem:[#allocation3 + $0x20] sm:$0xff] }
  0xd9   :  { %v109_v27 = vld [vmem:[#allocation3 + $0x180] sm:$0xff]  ;;  %359 = vmatpush1.msra.mxu0 %v65_v25 }
  0xda   :  { %v988_v40 = vadd.f32 %v972_v28, %v887_v33  ;;  %v974_v28 = vmul.f32 %v3825_v19, %v3780_v48  ;;  %v108_v33 = vld [vmem:[#allocation3 + $0x178] sm:$0xff]  ;;  %494 = vmatprep.subr.mxu0 %v109_v27  ;;  %3082 = vmatmul.mubr.msk.f32.vlgmr.msra.gmra.mxu0 %vm182_vm0, %v3684_v17  ;;  %v95_v48 = vld [vmem:[#allocation3 + $0x110] sm:$0xff] }
  0xdb   :  { %495 = vmatpush1.msra.mxu0 %v108_v33  ;;  %534 = vmatprep.mubr.f32.mxu0 %v3590_v3 }
  0xdd   :  { %v3842_v39 = vpop.permute.xlu1 %741 }
  0xde   :  { %v791_v6 = vmul.f32 %v3830_v20, %v3842_v39 }
  0xe2   :  { %v3846_v43 = vpop.permute.xlu1 %930 }
  0xe7   :  { %v3856_v57 = vpop.permute.xlu1 %746 }
  0xe8   :  { %v792_v27 = vmul.f32 %v3830_v20, %v3856_v57 }
  0xeb   :  { %v252_v60 = vpop.f32.mrf.mxu1 }
  0xec   :  { %v253_v62 = vadd.f32 %v252_v60, %v120_v58  ;;  %v3864_v63 = vpop.permute.xlu1 %934  ;;  %v732_v58 = vpop.permute.xlu0 %731  ;;  %v888_v60 = vadd.f32 %v872_v56, %v787_v55  ;;  %v96_v55 = vld [vmem:[#allocation3 + $0x118] sm:$0xff] }
  0xed   :  { %496 = vmatprep.subr.mxu0 %v96_v55  ;;  %v977_v25 = vmul.f32 %v3825_v19, %v3864_v63 }
  0xee   :  { %v3869_v2 = vrot.slane %v253_v62, %v3861_v59  ;;  %v989_v5 = vadd.f32 %v973_v42, %v888_v60  ;;  %v83_v42 = vld [vmem:[#allocation3 + $0xb0] sm:$0xff]  ;;  %497 = vmatpush1.msra.mxu0 %v95_v48  ;;  %v70_v60 = vld [vmem:[#allocation3 + $0x48] sm:$0xff] }
  0xef   :  { %498 = vmatprep.subr.mxu0 %v83_v42 }
  0xf0   :  { %v1016_v8 = vrot.slane %v3869_v2, %v3861_v59 }
  0xf1   :  { %v3875_v21 = vpop.permute.xlu1 %841 }
  0xf2   :  { %v3878_v15 = vrot.slane %v1016_v8, %v3849_v49  ;;  %v878_v63 = vmul.f32 %v3820_v18, %v3875_v21 }
  0xf4   :  { %v3881_v23 = vadd.f32 %v3878_v15, %v985_v22  ;;  %v3884_v46 = vadd.f32 %v3878_v15, %v986_v29  ;;  %v3907_v10 = vadd.f32 %v3878_v15, %v987_v34  ;;  %v873_v34 = vmul.f32 %v3820_v18, %v3809_v12 }
  0xf5   :  { %v3916_v61 = vadd.f32 %v3878_v15, %v988_v40  ;;  %v789_v22 = vmul.f32 %v3830_v20, %v732_v58 }
  0xf6   :  { %v3886_v24 = vpop.permute.xlu1 %938  ;;  %v1073_v30 = vmul.f32 %v3881_v23, %v3881_v23  ;;  %v1074_v31 = vmul.f32 %v3884_v46, %v3884_v46  ;;  %v1050_v29 = vadd.f32 %v3884_v46, %v3881_v23  ;;  %v1075_v14 = vmul.f32 %v3907_v10, %v3907_v10 }
  0xf7   :  { %v889_v8 = vadd.f32 %v873_v34, %v788_v44  ;;  %v975_v44 = vmul.f32 %v3825_v19, %v3783_v50  ;;  %v790_v50 = vmul.f32 %v3830_v20, %v3835_v26  ;;  %v976_v34 = vmul.f32 %v3825_v19, %v3846_v43 }
  0xf8   :  { %v1089_v45 = vadd.f32 %v1074_v31, %v1073_v30  ;;  %v1051_v0 = vadd.f32 %v1050_v29, %v3907_v10  ;;  %v874_v30 = vmul.f32 %v3820_v18, %v3815_v16  ;;  %v3929_v31 = vadd.f32 %v3878_v15, %v989_v5 }
  0xf9   :  { %v1076_v29 = vmul.f32 %v3916_v61, %v3916_v61  ;;  %v990_v36 = vadd.f32 %v974_v28, %v889_v8  ;;  %v1009_v16 = vcombine.high %v3869_v2, %v3869_v2  ;;  %v82_v2 = vld [vmem:[#allocation3 + $0xa8] sm:$0xff]  ;;  %v752_v8 = vpop.permute.xlu0 %751  ;;  %v877_v43 = vmul.f32 %v3820_v18, %v3803_v9 }
  0xfa   :  { %v1090_v47 = vadd.f32 %v1089_v45, %v1075_v14  ;;  %v1052_v12 = vadd.f32 %v1051_v0, %v3916_v61  ;;  %v890_v37 = vadd.f32 %v874_v30, %v789_v22  ;;  %v875_v45 = vmul.f32 %v3820_v18, %v3840_v35  ;;  %499 = vmatpush1.msra.mxu0 %v82_v2 }
  0xfb   :  { %v3900_v32 = vpop.permute.xlu1 %845  ;;  %v3946_v53 = vadd.f32 %v3878_v15, %v990_v36  ;;  %v1077_v58 = vmul.f32 %v3929_v31, %v3929_v31  ;;  %v876_v0 = vmul.f32 %v3820_v18, %v3799_v7  ;;  %v1023_v5 = vrot.slane %v1009_v16, %v3861_v59  ;;  %500 = vmatprep.subr.mxu0 %v70_v60 }
  0xfc   :  { %v1091_v38 = vadd.f32 %v1090_v47, %v1076_v29  ;;  %v1053_v40 = vadd.f32 %v1052_v12, %v3929_v31  ;;  %v991_v35 = vadd.f32 %v975_v44, %v890_v37  ;;  %v891_v39 = vadd.f32 %v875_v45, %v790_v50  ;;  %501 = vmatpush1.msra.mxu0 %v69_v4 }
  0xfd   :  { %v1078_v26 = vmul.f32 %v3946_v53, %v3946_v53  ;;  %v892_v47 = vadd.f32 %v876_v0, %v791_v6  ;;  %3084 = vmatmul.mubr.msk.f32.vlgmr.msra.gmra.mxu0 %vm182_vm0, %v3684_v17  ;;  %3232 = vmatprep.subr.mxu0 %v3590_v3  ;;  %v3975_v30 = vrot.slane %v1023_v5, %v3849_v49  ;;  %v757_v33 = vpop.permute.xlu0 %756 }
  0xfe   :  { %v1092_v14 = vadd.f32 %v1091_v38, %v1077_v58  ;;  %v1054_v7 = vadd.f32 %v1053_v40, %v3946_v53  ;;  %v3961_v22 = vadd.f32 %v3878_v15, %v991_v35  ;;  %v992_v12 = vadd.f32 %v976_v34, %v891_v39  ;;  %3240 = vmatprep.mubr.msk.f32.mxu0 %vm3593_vm1, %v3590_v3 }
  0xff   :  { %v793_v29 = vmul.f32 %v3830_v20, %v752_v8  ;;  %v978_v36 = vmul.f32 %v3825_v19, %v3886_v24  ;;  %v993_v37 = vadd.f32 %v977_v25, %v892_v47  ;;  %v893_v38 = vadd.f32 %v877_v43, %v792_v27 }
 0x100   :  { %v3920_v62 = vpop.permute.xlu1 %761  ;;  %v1093_v28 = vadd.f32 %v1092_v14, %v1078_v26  ;;  %v1055_v9 = vadd.f32 %v1054_v7, %v3961_v22  ;;  %v3982_v57 = vadd.f32 %v3878_v15, %v992_v12  ;;  %v1079_v17 = vmul.f32 %v3961_v22, %v3961_v22 }
 0x101   :  { %v794_v16 = vmul.f32 %v3830_v20, %v757_v33  ;;  %v3990_v40 = vadd.f32 %v3975_v30, %v993_v37  ;;  %v894_v42 = vadd.f32 %v878_v63, %v793_v29  ;;  %v879_v15 = vmul.f32 %v3820_v18, %v3900_v32  ;;  %v777_v4 = vpop.permute.xlu0 %776 }
 0x102   :  { %v1094_v48 = vadd.f32 %v1093_v28, %v1079_v17  ;;  %v1056_v21 = vadd.f32 %v1055_v9, %v3982_v57  ;;  %v1080_v44 = vmul.f32 %v3982_v57, %v3982_v57  ;;  %v994_v45 = vadd.f32 %v978_v36, %v893_v38 }
 0x103   :  { %v979_v24 = vmul.f32 %v3825_v19, %v3786_v52  ;;  %v1081_v60 = vmul.f32 %v3990_v40, %v3990_v40  ;;  %v895_v35 = vadd.f32 %v879_v15, %v794_v16  ;;  %v795_v34 = vmul.f32 %v3830_v20, %v3920_v62 }
 0x104   :  { %v1095_v2 = vadd.f32 %v1094_v48, %v1080_v44  ;;  %v1057_v6 = vadd.f32 %v1056_v21, %v3990_v40  ;;  %v4005_v32 = vadd.f32 %v3975_v30, %v994_v45  ;;  %v881_v7 = vmul.f32 %v3820_v18, %v3807_v11 }
 0x105   :  { %v3933_v56 = vpop.permute.xlu1 %849  ;;  %v995_v50 = vadd.f32 %v979_v24, %v894_v42  ;;  %v963_v12 = vpop.permute.xlu0 %962  ;;  %v798_v63 = vmul.f32 %v3830_v20, %v777_v4  ;;  %v882_v48 = vmul.f32 %v3820_v18, %v3811_v13 }
 0x106   :  { %v880_v0 = vmul.f32 %v3820_v18, %v3933_v56  ;;  %v980_v56 = vmul.f32 %v3825_v19, %v3789_v54  ;;  %v1096_v8 = vadd.f32 %v1095_v2, %v1081_v60  ;;  %v1058_v43 = vadd.f32 %v1057_v6, %v4005_v32 }
 0x107   :  { %v4018_v62 = vadd.f32 %v3975_v30, %v995_v50  ;;  %v984_v37 = vmul.f32 %v3825_v19, %v963_v12 }
 0x108   :  { %v896_v39 = vadd.f32 %v880_v0, %v795_v34  ;;  %v996_v47 = vadd.f32 %v980_v56, %v895_v35 }
 0x109   :  { %v1059_v11 = vadd.f32 %v1058_v43, %v4018_v62 }
 0x10a   :  { %v767_v1 = vpop.permute.xlu1 %766  ;;  %v4024_v29 = vadd.f32 %v3975_v30, %v996_v47 }
 0x10b   :  { %v796_v14 = vmul.f32 %v3830_v20, %v767_v1  ;;  %v1082_v1 = vmul.f32 %v4005_v32, %v4005_v32 }
 0x10c   :  { %v1084_v42 = vmul.f32 %v4024_v29, %v4024_v29  ;;  %v1060_v15 = vadd.f32 %v1059_v11, %v4024_v29 }
 0x10d   :  { %v897_v25 = vadd.f32 %v881_v7, %v796_v14  ;;  %v1097_v27 = vadd.f32 %v1096_v8, %v1082_v1 }
 0x10f   :  { %v951_v55 = vpop.permute.xlu1 %950 }
 0x110   :  { %v981_v52 = vmul.f32 %v3825_v19, %v951_v55  ;;  %v1083_v55 = vmul.f32 %v4018_v62, %v4018_v62 }
 0x112   :  { %v997_v54 = vadd.f32 %v981_v52, %v896_v39  ;;  %v1098_v16 = vadd.f32 %v1097_v27, %v1083_v55 }
 0x114   :  { %v772_v58 = vpop.permute.xlu1 %771  ;;  %v4031_v17 = vadd.f32 %v3975_v30, %v997_v54  ;;  %v1099_v13 = vadd.f32 %v1098_v16, %v1084_v42  ;;  %v147_v42 = vsub.s32 7, %v3844_v41 }
 0x115   :  { %v797_v36 = vmul.f32 %v3830_v20, %v772_v58 }
 0x116   :  { %v1085_v45 = vmul.f32 %v4031_v17, %v4031_v17  ;;  %v1061_v2 = vadd.f32 %v1060_v15, %v4031_v17 }
 0x117   :  { %v898_v20 = vadd.f32 %v882_v48, %v797_v36  ;;  %v254_v36 = vpop.f32.mrf.mxu1 }
 0x118   :  { %v1100_v6 = vadd.f32 %v1099_v13, %v1085_v45  ;;  %v148_v45 = vrot.slane %v3854_v51, %v147_v42 }
 0x119   :  { %v955_v5 = vpop.permute.xlu1 %954 }
 0x11a   :  { %v982_v26 = vmul.f32 %v3825_v19, %v955_v5 }
 0x11c   :  { %v998_v28 = vadd.f32 %v982_v26, %v897_v25 }
 0x11e   :  { %v862_v9 = vpop.permute.xlu1 %861  ;;  %v4038_v21 = vadd.f32 %v3975_v30, %v998_v28 }
 0x11f   :  { %v883_v33 = vmul.f32 %v3820_v18, %v862_v9 }
 0x120   :  { %v1086_v18 = vmul.f32 %v4038_v21, %v4038_v21  ;;  %v1062_v60 = vadd.f32 %v1061_v2, %v4038_v21 }
 0x121   :  { %v899_v38 = vadd.f32 %v883_v33, %v798_v63 }
 0x122   :  { %v1101_v34 = vadd.f32 %v1100_v6, %v1086_v18 }
 0x123   :  { %v959_v44 = vpop.permute.xlu1 %958  ;;  %v1000_v58 = vadd.f32 %v984_v37, %v899_v38  ;;  %v4062_v37 = vpop.f32.mrf.mxu1  ;;  %v123_v38 = vsub.s32 1, %v3844_v41 }
 0x124   :  { %v983_v24 = vmul.f32 %v3825_v19, %v959_v44 }
 0x125   :  { %v4051_v50 = vadd.f32 %v3975_v30, %v1000_v58  ;;  %v4065_v48 = vpop.f32.mrf.mxu1  ;;  %v124_v16 = vrot.slane %v3854_v51, %v123_v38 }
 0x126   :  { %v999_v0 = vadd.f32 %v983_v24, %v898_v20 }
 0x127   :  { %v1088_v52 = vmul.f32 %v4051_v50, %v4051_v50  ;;  %v4071_v15 = vpop.f32.mrf.mxu1  ;;  %v255_v44 = vadd.f32 %v254_v36, %v124_v16 }
 0x128   :  { %v4054_v35 = vadd.f32 %v3975_v30, %v999_v0 }
 0x129   :  { %v467_v58 = vpop.f32.mrf.mxu1 }
 0x12a   :  { %v1063_v14 = vadd.f32 %v1062_v60, %v4054_v35  ;;  %v1087_v19 = vmul.f32 %v4054_v35, %v4054_v35  ;;  %v468_v2 = vadd.f32 %v467_v58, %v148_v45 }
 0x12c   :  { %v1064_v56 = vadd.f32 %v1063_v14, %v4051_v50  ;;  %v1102_v4 = vadd.f32 %v1101_v34, %v1087_v19 }
 0x12e   :  { %v1103_v5 = vadd.f32 %v1102_v4, %v1088_v52  ;;  %v1065_v7 = vrot.slane %v1064_v56, 4 }
 0x130   :  { %v1104_v8 = vrot.slane %v1103_v5, 4  ;;  %v1066_v39 = vadd.f32 %v1065_v7, %v1064_v56 }
 0x132   :  { %v1105_v26 = vadd.f32 %v1104_v8, %v1103_v5  ;;  %v1067_v43 = vrot.slane %v1066_v39, 2 }
 0x134   :  { %v1068_v30 = vadd.f32 %v1067_v43, %v1066_v39  ;;  %v1106_v47 = vrot.slane %v1105_v26, 2 }
 0x136   :  { %v1069_v1 = vrot.slane %v1068_v30, 1  ;;  %v1107_v25 = vadd.f32 %v1106_v47, %v1105_v26 }
 0x138   :  { %v1070_v54 = vadd.f32 %v1069_v1, %v1068_v30  ;;  %v1108_v12 = vrot.slane %v1107_v25, 1 }
 0x13a   :  { %v1072_v27 = vmul.f32 0.0078125, %v1070_v54  ;;  %v1109_v28 = vadd.f32 %v1108_v12, %v1107_v25 }
 0x13c   :  { %v1110_v9 = vmul.f32 0.0078125, %v1109_v28  ;;  %v1111_v11 = vmul.f32 %v1072_v27, %v1072_v27 }
 0x13e   :  { %v1112_v63 = vsub.f32 %v1110_v9, %v1111_v11 }
 0x140   :  { %v1113_v33 = vmax.f32 %v1112_v63, 0.0 }
 0x142   :  { %v1114_v55 = vadd.f32 1e-05, %v1113_v33 }
 0x144   :  { %3522 = vrsqrt.f32 %v1114_v55 }
 0x151   :  { %v3523_v20 = vpop.eup %3522 }
 0x152   :  { %v1116_v24 = vmul.f32 %v3523_v20, %v255_v44 }
 0x154   :  { %v1117_v13 = vmul.f32 %v1116_v24, %v1072_v27  ;;  %v1126_v18 = vrot.slane %v1116_v24, %v3861_v59 }
 0x156   :  { %v1118_v0 = vsub.f32 %v468_v2, %v1117_v13  ;;  %v1127_v6 = vcombine.high %v1126_v18, %v1126_v18  ;;  %v1134_v60 = vrot.slane %v1126_v18, %v3861_v59 }
 0x158   :  { %v1145_v34 = vrot.slane %v1134_v60, %v3849_v49  ;;  %v1175_v14 = vrot.slane %v1118_v0, %v3861_v59  ;;  %v1141_v19 = vrot.slane %v1127_v6, %v3861_v59 }
 0x15a   :  { %v1176_v52 = vcombine.high %v1175_v14, %v1175_v14  ;;  %v1183_v56 = vrot.slane %v1175_v14, %v3861_v59  ;;  %v1152_v4 = vmul.f32 %v1145_v34, %v3881_v23  ;;  %v1153_v8 = vmul.f32 %v1145_v34, %v3884_v46 }
 0x15b   :  { %v1154_v39 = vmul.f32 %v1145_v34, %v3907_v10  ;;  %v1155_v26 = vmul.f32 %v1145_v34, %v3916_v61  ;;  %v1156_v43 = vmul.f32 %v1145_v34, %v3929_v31  ;;  %v1157_v30 = vmul.f32 %v1145_v34, %v3946_v53 }
 0x15c   :  { %v1190_v5 = vrot.slane %v1176_v52, %v3861_v59  ;;  %v1194_v7 = vrot.slane %v1183_v56, %v3849_v49  ;;  %v1149_v47 = vrot.slane %v1141_v19, %v3849_v49  ;;  %v1158_v28 = vmul.f32 %v1145_v34, %v3961_v22 }
 0x15d   :  { %v1159_v53 = vmul.f32 %v1145_v34, %v3982_v57 }
 0x15e   :  { %v1201_v1 = vadd.f32 %v1194_v7, %v1152_v4  ;;  %v1202_v25 = vadd.f32 %v1194_v7, %v1153_v8  ;;  %v1203_v54 = vadd.f32 %v1194_v7, %v1154_v39  ;;  %v1204_v23 = vadd.f32 %v1194_v7, %v1155_v26 }
 0x15f   :  { %v1205_v12 = vadd.f32 %v1194_v7, %v1156_v43  ;;  %v1206_v27 = vadd.f32 %v1194_v7, %v1157_v30  ;;  %v1198_v46 = vrot.slane %v1190_v5, %v3849_v49  ;;  %v1160_v55 = vmul.f32 %v1149_v47, %v3990_v40  ;;  %v86_v30 = vld [vmem:[#allocation3 + $0xc8] sm:$0xff] }
 0x160   :  { %v1217_v9 = vmax.f32 %v1201_v1, 0.0  ;;  %v1218_v10 = vmax.f32 %v1202_v25, 0.0  ;;  %v1219_v11 = vmax.f32 %v1203_v54, 0.0  ;;  %v1220_v61 = vmax.f32 %v1204_v23, 0.0  ;;  %v3490_v1 = vld [vmem:[#allocation5 + $0x78] sm:$0xff]   ;;  %v3491_v54 = vld [vmem:[#allocation5 + $0x70] sm:$0xff]  }
 0x161   :  { %v1221_v63 = vmax.f32 %v1205_v12, 0.0  ;;  %v1222_v31 = vmax.f32 %v1206_v27, 0.0  ;;  %v1161_v36 = vmul.f32 %v1149_v47, %v4005_v32  ;;  %v1207_v42 = vadd.f32 %v1194_v7, %v1158_v28  ;;  %v3534_v25 = vld [vmem:[%s4700_s1] sm:$0x3]  ;;  %v3492_v23 = vld [vmem:[#allocation5 + $0x68] sm:$0xff]   ;;  %v3495_v28 = vld [vmem:[#allocation5 + $0x50] sm:$0xff]  }
 0x162   :  { %v1233_v33 = vpack.c.bf16 %v1218_v10, %v1217_v9  ;;  %v1234_v16 = vpack.c.bf16 %v1220_v61, %v1219_v11  ;;  %v1208_v44 = vadd.f32 %v1194_v7, %v1159_v53  ;;  %v1209_v45 = vadd.f32 %v1198_v46, %v1160_v55  ;;  %v3493_v12 = vld [vmem:[#allocation5 + $0x60] sm:$0xff]   ;;  %v3494_v27 = vld [vmem:[#allocation5 + $0x58] sm:$0xff]  }
 0x163   :  { %v1235_v22 = vpack.c.bf16 %v1222_v31, %v1221_v63  ;;  %v1210_v20 = vadd.f32 %v1198_v46, %v1161_v36  ;;  %v1166_v58 = vmul.f32 %v1149_v47, %v4054_v35  ;;  %v1167_v24 = vmul.f32 %v1149_v47, %v4051_v50  ;;  %v3497_v9 = vld [vmem:[#allocation5 + $0x40] sm:$0xff]  }
 0x164   :  { %3259 = vmatprep.mubr.bf16.mxu1 %v1233_v33  ;;  %v1223_v2 = vmax.f32 %v1207_v42, 0.0  ;;  %v1224_v57 = vmax.f32 %v1208_v44, 0.0  ;;  %v1225_v18 = vmax.f32 %v1209_v45, 0.0  ;;  %v1162_v32 = vmul.f32 %v1149_v47, %v4018_v62 }
 0x165   :  { %3260 = vmatmul.mubr.bf16.vlgmr.msra.gmra.mxu1 %v1234_v16  ;;  %v1215_v13 = vadd.f32 %v1198_v46, %v1166_v58  ;;  %v1226_v40 = vmax.f32 %v1210_v20, 0.0  ;;  %v1216_v0 = vadd.f32 %v1198_v46, %v1167_v24  ;;  %v1163_v6 = vmul.f32 %v1149_v47, %v4024_v29 }
 0x166   :  { %3263 = vmatprep.mubr.bf16.mxu1 %v1235_v22  ;;  %v1164_v34 = vmul.f32 %v1149_v47, %v4031_v17  ;;  %v1165_v14 = vmul.f32 %v1149_v47, %v4038_v21  ;;  %v1236_v35 = vpack.c.bf16 %v1224_v57, %v1223_v2  ;;  %v1211_v52 = vadd.f32 %v1198_v46, %v1162_v32  ;;  %v112_v17 = vld [vmem:[#allocation3 + $0x198] sm:$0xff]  ;;  %v99_v21 = vld [vmem:[#allocation3 + $0x130] sm:$0xff]  ;;  %v73_v47 = vld [vmem:[#allocation3 + $0x60] sm:$0xff] }
 0x167   :  { %v1231_v60 = vmax.f32 %v1215_v13, 0.0  ;;  %v1232_v19 = vmax.f32 %v1216_v0, 0.0  ;;  %v1212_v56 = vadd.f32 %v1198_v46, %v1163_v6  ;;  %v1237_v50 = vpack.c.bf16 %v1226_v40, %v1225_v18  ;;  %3233 = vmatpush3.msra.mxu0 %v112_v17 }
 0x168   :  { %v1213_v4 = vadd.f32 %v1198_v46, %v1164_v34  ;;  %v1214_v5 = vadd.f32 %v1198_v46, %v1165_v14  ;;  %v1227_v8 = vmax.f32 %v1211_v52, 0.0  ;;  %3234 = vmatprep.subr.mxu0 %v3590_v3  ;;  %v3496_v46 = vld [vmem:[#allocation5 + $0x48] sm:$0xff]  }
 0x169   :  { %v1240_v7 = vpack.c.bf16 %v1232_v19, %v1231_v60  ;;  %v1228_v39 = vmax.f32 %v1212_v56, 0.0  ;;  %3235 = vmatpush3.msra.mxu0 %v99_v21 }
 0x16a   :  { %v1229_v62 = vmax.f32 %v1213_v4, 0.0  ;;  %v1230_v26 = vmax.f32 %v1214_v5, 0.0  ;;  %3236 = vmatprep.subr.mxu0 %v3590_v3  ;;  %v4109_v10 = vpop.f32.mrf.mxu1 }
 0x16b   :  { %v1238_v29 = vpack.c.bf16 %v1228_v39, %v1227_v8  ;;  %3237 = vmatpush3.msra.mxu0 %v86_v30 }
 0x16c   :  { %v1239_v43 = vpack.c.bf16 %v1230_v26, %v1229_v62  ;;  %3238 = vmatprep.subr.mxu0 %v3590_v3  ;;  %v4111_v11 = vpop.f32.mrf.mxu1 }
 0x16d   :  { %3264 = vmatmul.mubr.bf16.gmra.mxu1 %v1236_v35  ;;  %3239 = vmatpush3.msra.mxu0 %v73_v47 }
 0x16e   :  { %3267 = vmatprep.mubr.bf16.mxu1 %v1237_v50  ;;  %3241 = vmatmul.mubr.msk.f32.vlgmr.msra.gmra.mxu0 %vm182_vm0, %v3534_v25 }
 0x16f   :  { %3275 = vmatprep.subr.bf16.mxu0 %v3490_v1 }
 0x170   :  { %3276 = vmatpush3.bf16.msra.mxu0 %v3490_v1 }
 0x171   :  { %3277 = vmatprep.subr.bf16.mxu0 %v3491_v54 }
 0x174   :  { %3278 = vmatpush3.bf16.msra.mxu0 %v3491_v54 }
 0x175   :  { %3268 = vmatmul.mubr.bf16.gmra.mxu1 %v1238_v29  ;;  %3279 = vmatprep.subr.bf16.mxu0 %v3492_v23 }
 0x176   :  { %3271 = vmatprep.mubr.bf16.mxu1 %v1239_v43 }
 0x178   :  { %3280 = vmatpush3.bf16.msra.mxu0 %v3492_v23 }
 0x179   :  { %3281 = vmatprep.subr.bf16.mxu0 %v3493_v12 }
 0x17c   :  { %3282 = vmatpush3.bf16.msra.mxu0 %v3493_v12 }
 0x17d   :  { %3272 = vmatmul.mubr.bf16.gmra.mxu1 %v1240_v7  ;;  %3283 = vmatprep.subr.bf16.mxu0 %v3494_v27 }
 0x180   :  { %3284 = vmatpush3.bf16.msra.mxu0 %v3494_v27 }
 0x181   :  { %3285 = vmatprep.subr.bf16.mxu0 %v3495_v28 }
 0x184   :  { %3286 = vmatpush3.bf16.msra.mxu0 %v3495_v28 }
 0x185   :  { %3287 = vmatprep.subr.bf16.mxu0 %v3496_v46 }
 0x188   :  { %3288 = vmatpush3.bf16.msra.mxu0 %v3496_v46 }
 0x189   :  { %3289 = vmatprep.subr.bf16.mxu0 %v3497_v9 }
 0x18c   :  { %3290 = vmatpush3.bf16.msra.mxu0 %v3497_v9 }
 0x225   :  { %v4113_v61 = vpop.f32.mrf.mxu1 }
 0x226   :  { %v1426_v42 = vmul.f32 %v4113_v61, %v4113_v61 }
 0x227   :  { %v4115_v63 = vpop.f32.mrf.mxu1 }
 0x228   :  { %v1424_v33 = vmul.f32 %v4115_v63, %v4115_v63 }
 0x229   :  { %v4117_v31 = vpop.f32.mrf.mxu1 }
 0x22a   :  { %v1427_v20 = vmul.f32 %v4117_v31, %v4117_v31 }
 0x22b   :  { %v4119_v53 = vpop.f32.mrf.mxu1 }
 0x22c   :  { %v1402_v55 = vadd.f32 %v4119_v53, %v4115_v63  ;;  %v1425_v36 = vmul.f32 %v4119_v53, %v4119_v53 }
 0x22d   :  { %v4127_v16 = vpop.f32.mrf.mxu1 }
 0x22e   :  { %v1403_v44 = vadd.f32 %v4113_v61, %v1402_v55  ;;  %v1440_v22 = vadd.f32 %v1425_v36, %v1424_v33  ;;  %v1430_v34 = vmul.f32 %v4127_v16, %v4127_v16 }
 0x22f   :  { %v4132_v45 = vpop.f32.mrf.mxu1 }
 0x230   :  { %v1441_v58 = vadd.f32 %v1440_v22, %v1426_v42  ;;  %v1404_v24 = vadd.f32 %v4117_v31, %v1403_v44  ;;  %v1428_v13 = vmul.f32 %v4132_v45, %v4132_v45 }
 0x231   :  { %v4137_v2 = vpop.f32.mrf.mxu1 }
 0x232   :  { %v1405_v57 = vadd.f32 %v1404_v24, %v4132_v45  ;;  %v1442_v18 = vadd.f32 %v1441_v58, %v1427_v20  ;;  %v1431_v52 = vmul.f32 %v4137_v2, %v4137_v2 }
 0x233   :  { %v4142_v40 = vpop.f32.mrf.mxu1 }
 0x234   :  { %v1443_v0 = vadd.f32 %v1442_v18, %v1428_v13  ;;  %v1406_v32 = vadd.f32 %v1405_v57, %v4142_v40  ;;  %v1429_v6 = vmul.f32 %v4142_v40, %v4142_v40 }
 0x235   :  { %v4147_v60 = vpop.f32.mrf.mxu1 }
 0x236   :  { %v1407_v14 = vadd.f32 %v4127_v16, %v1406_v32  ;;  %v1444_v19 = vadd.f32 %v1443_v0, %v1429_v6  ;;  %v1434_v17 = vmul.f32 %v4147_v60, %v4147_v60 }
 0x237   :  { %v4152_v35 = vpop.f32.mrf.mxu1 }
 0x238   :  { %v1445_v56 = vadd.f32 %v1444_v19, %v1430_v34  ;;  %v1408_v50 = vadd.f32 %v4137_v2, %v1407_v14  ;;  %v1432_v7 = vmul.f32 %v4152_v35, %v4152_v35 }
 0x239   :  { %v4157_v4 = vpop.f32.mrf.mxu1 }
 0x23a   :  { %v1409_v5 = vadd.f32 %v1408_v50, %v4152_v35  ;;  %v1446_v8 = vadd.f32 %v1445_v56, %v1431_v52  ;;  %v1435_v1 = vmul.f32 %v4157_v4, %v4157_v4 }
 0x23b   :  { %v4162_v39 = vpop.f32.mrf.mxu1 }
 0x23c   :  { %v1447_v62 = vadd.f32 %v1446_v8, %v1432_v7  ;;  %v1410_v26 = vadd.f32 %v1409_v5, %v4162_v39  ;;  %v1433_v29 = vmul.f32 %v4162_v39, %v4162_v39 }
 0x23d   :  { %v4167_v43 = vpop.f32.mrf.mxu1 }
 0x23e   :  { %v1411_v21 = vadd.f32 %v4147_v60, %v1410_v26  ;;  %v1448_v30 = vadd.f32 %v1447_v62, %v1433_v29  ;;  %v1438_v36 = vmul.f32 %v4167_v43, %v4167_v43 }
 0x23f   :  { %v4172_v47 = vpop.f32.mrf.mxu1 }
 0x240   :  { %v1449_v25 = vadd.f32 %v1448_v30, %v1434_v17  ;;  %v1412_v54 = vadd.f32 %v4157_v4, %v1411_v21  ;;  %v1436_v27 = vmul.f32 %v4172_v47, %v4172_v47  ;;  %v127_v17 = vsub.s32 2, %v3844_v41  ;;  %v4194_v21 = vpop.f32.mrf.mxu0 }
 0x241   :  { %v4177_v23 = vpop.f32.mrf.mxu1 }
 0x242   :  { %v1413_v12 = vadd.f32 %v1412_v54, %v4172_v47  ;;  %v1450_v28 = vadd.f32 %v1449_v25, %v1435_v1  ;;  %v1439_v22 = vmul.f32 %v4177_v23, %v4177_v23  ;;  %v128_v30 = vrot.slane %v3854_v51, %v127_v17  ;;  %v4202_v1 = vld [vmem:[%s4703_s4 + $0x8] sm:$0x1f]  ;;  %v4206_v54 = vpop.f32.mrf.mxu0 }
 0x243   :  { %v4182_v46 = vpop.f32.mrf.mxu1  ;;  %v152_v25 = vrot.slane %v4202_v1, %v3849_v49 }
 0x244   :  { %v1451_v9 = vadd.f32 %v1450_v28, %v1436_v27  ;;  %v1414_v33 = vadd.f32 %v1413_v12, %v4182_v46  ;;  %v1437_v55 = vmul.f32 %v4182_v46, %v4182_v46  ;;  %v324_v12 = vadd.f32 %v4062_v37, %v128_v30  ;;  %v536_v28 = vpop.f32.mrf.mxu0 }
 0x246   :  { %v1415_v42 = vadd.f32 %v4167_v43, %v1414_v33  ;;  %v1452_v44 = vadd.f32 %v1451_v9, %v1437_v55  ;;  %v537_v33 = vadd.f32 %v536_v28, %v152_v25 }
 0x248   :  { %v1416_v20 = vadd.f32 %v4177_v23, %v1415_v42  ;;  %v1453_v58 = vadd.f32 %v1452_v44, %v1438_v36 }
 0x24a   :  { %v1417_v24 = vrot.slane %v1416_v20, 4  ;;  %v1454_v57 = vadd.f32 %v1453_v58, %v1439_v22 }
 0x24c   :  { %v1418_v13 = vadd.f32 %v1417_v24, %v1416_v20  ;;  %v1455_v18 = vrot.slane %v1454_v57, 4 }
 0x24e   :  { %v1419_v0 = vrot.slane %v1418_v13, 2  ;;  %v1456_v32 = vadd.f32 %v1455_v18, %v1454_v57 }
 0x250   :  { %v1420_v6 = vadd.f32 %v1419_v0, %v1418_v13  ;;  %v1457_v34 = vrot.slane %v1456_v32, 2 }
 0x252   :  { %v1421_v14 = vrot.slane %v1420_v6, 1  ;;  %v1458_v19 = vadd.f32 %v1457_v34, %v1456_v32 }
 0x254   :  { %v1422_v52 = vadd.f32 %v1421_v14, %v1420_v6  ;;  %v1459_v56 = vrot.slane %v1458_v19, 1 }
 0x256   :  { %v1423_v50 = vmul.f32 0.0078125, %v1422_v52  ;;  %v1460_v5 = vadd.f32 %v1459_v56, %v1458_v19 }
 0x258   :  { %v1461_v7 = vmul.f32 0.0078125, %v1460_v5  ;;  %v1462_v8 = vmul.f32 %v1423_v50, %v1423_v50 }
 0x25a   :  { %v1463_v62 = vsub.f32 %v1461_v7, %v1462_v8 }
 0x25c   :  { %v1464_v26 = vmax.f32 %v1463_v62, 0.0 }
 0x25e   :  { %v1465_v29 = vadd.f32 1e-05, %v1464_v26 }
 0x260   :  { %3524 = vrsqrt.f32 %v1465_v29 }
 0x26d   :  { %v3525_v27 = vpop.eup %3524 }
 0x26e   :  { %v1467_v9 = vmul.f32 %v3525_v27, %v324_v12 }
 0x270   :  { %v1477_v55 = vrot.slane %v1467_v9, %v3861_v59  ;;  %v1468_v36 = vmul.f32 %v1467_v9, %v1423_v50 }
 0x272   :  { %v1478_v51 = vcombine.high %v1477_v55, %v1477_v55  ;;  %v1485_v42 = vrot.slane %v1477_v55, %v3861_v59  ;;  %v1469_v44 = vsub.f32 %v537_v33, %v1468_v36 }
 0x274   :  { %v1492_v22 = vrot.slane %v1478_v51, %v3861_v59  ;;  %v1496_v20 = vrot.slane %v1485_v42, %v3849_v49  ;;  %v1526_v58 = vrot.slane %v1469_v44, %v3861_v59 }
 0x276   :  { %v1500_v24 = vrot.slane %v1492_v22, %v3849_v49  ;;  %v1527_v37 = vcombine.high %v1526_v58, %v1526_v58  ;;  %v1534_v57 = vrot.slane %v1526_v58, %v3861_v59  ;;  %v1503_v13 = vmul.f32 %v1496_v20, %v4115_v63 }
 0x277   :  { %v1504_v32 = vmul.f32 %v1496_v20, %v4119_v53  ;;  %v1505_v6 = vmul.f32 %v4113_v61, %v1496_v20  ;;  %v1506_v34 = vmul.f32 %v4117_v31, %v1496_v20  ;;  %v1507_v14 = vmul.f32 %v1496_v20, %v4132_v45 }
 0x278   :  { %v1541_v18 = vrot.slane %v1527_v37, %v3861_v59  ;;  %v1545_v0 = vrot.slane %v1534_v57, %v3849_v49  ;;  %v1508_v19 = vmul.f32 %v1496_v20, %v4142_v40  ;;  %v1512_v52 = vmul.f32 %v1500_v24, %v4162_v39 }
 0x279   :  { %v1509_v53 = vmul.f32 %v4127_v16, %v1496_v20  ;;  %v1511_v31 = vmul.f32 %v1500_v24, %v4152_v35  ;;  %v1510_v39 = vmul.f32 %v4137_v2, %v1496_v20  ;;  %v1516_v28 = vmul.f32 %v1500_v24, %v4182_v46 }
 0x27a   :  { %v1549_v56 = vrot.slane %v1541_v18, %v3849_v49  ;;  %v1552_v50 = vadd.f32 %v1545_v0, %v1503_v13  ;;  %v1553_v63 = vadd.f32 %v1545_v0, %v1504_v32  ;;  %v1554_v5 = vadd.f32 %v1545_v0, %v1505_v6 }
 0x27b   :  { %v1555_v7 = vadd.f32 %v1545_v0, %v1506_v34  ;;  %v1556_v8 = vadd.f32 %v1545_v0, %v1507_v14  ;;  %v1557_v62 = vadd.f32 %v1545_v0, %v1508_v19  ;;  %v1558_v33 = vadd.f32 %v1545_v0, %v1509_v53  ;;  %v3500_v53 = vld [vmem:[#allocation5 + $0xa8] sm:$0xff]  }
 0x27c   :  { %v1568_v26 = vmax.f32 %v1552_v50, 0.0  ;;  %v1569_v61 = vmax.f32 %v1553_v63, 0.0  ;;  %v1570_v29 = vmax.f32 %v1554_v5, 0.0  ;;  %v1560_v12 = vadd.f32 %v1549_v56, %v1511_v31  ;;  %v3504_v31 = vld [vmem:[#allocation5 + $0x88] sm:$0xff]  }
 0x27d   :  { %v1571_v45 = vmax.f32 %v1555_v7, 0.0  ;;  %v1572_v30 = vmax.f32 %v1556_v8, 0.0  ;;  %v1573_v40 = vmax.f32 %v1557_v62, 0.0  ;;  %v1561_v27 = vadd.f32 %v1549_v56, %v1512_v52  ;;  %v3498_v8 = vld [vmem:[#allocation5 + $0xb8] sm:$0xff]   ;;  %v3499_v62 = vld [vmem:[#allocation5 + $0xb0] sm:$0xff]  }
 0x27e   :  { %v1584_v25 = vpack.c.bf16 %v1569_v61, %v1568_v26  ;;  %v1559_v55 = vadd.f32 %v1545_v0, %v1510_v39  ;;  %v1576_v36 = vmax.f32 %v1560_v12, 0.0  ;;  %v1515_v42 = vmul.f32 %v1500_v24, %v4172_v47  ;;  %3307 = vmatprep.subr.bf16.mxu1 %v3498_v8  ;;  %v3501_v26 = vld [vmem:[#allocation5 + $0xa0] sm:$0xff]   ;;  %v3502_v61 = vld [vmem:[#allocation5 + $0x98] sm:$0xff]  }
 0x27f   :  { %v1585_v9 = vpack.c.bf16 %v1571_v45, %v1570_v29  ;;  %v1586_v16 = vpack.c.bf16 %v1573_v40, %v1572_v30  ;;  %v1577_v51 = vmax.f32 %v1561_v27, 0.0  ;;  %v1565_v35 = vadd.f32 %v1549_v56, %v1516_v28  ;;  %3308 = vmatpush3.bf16.msra.mxu1 %v3498_v8  ;;  %v3503_v29 = vld [vmem:[#allocation5 + $0x90] sm:$0xff]   ;;  %v3505_v45 = vld [vmem:[#allocation5 + $0x80] sm:$0xff]  }
 0x280   :  { %3291 = vmatprep.mubr.bf16.mxu0 %v1584_v25  ;;  %v1517_v44 = vmul.f32 %v4167_v43, %v1500_v24  ;;  %v1564_v22 = vadd.f32 %v1549_v56, %v1515_v42  ;;  %v1518_v20 = vmul.f32 %v4177_v23, %v1500_v24  ;;  %v1574_v58 = vmax.f32 %v1558_v33, 0.0  ;;  %3309 = vmatprep.subr.bf16.mxu1 %v3499_v62 }
 0x281   :  { %3292 = vmatmul.mubr.bf16.vlgmr.msra.gmra.mxu0 %v1585_v9  ;;  %v1588_v2 = vpack.c.bf16 %v1577_v51, %v1576_v36  ;;  %v1575_v46 = vmax.f32 %v1559_v55, 0.0  ;;  %v1581_v37 = vmax.f32 %v1565_v35, 0.0  ;;  %v1513_v0 = vmul.f32 %v4147_v60, %v1500_v24 }
 0x282   :  { %3295 = vmatprep.mubr.bf16.mxu0 %v1586_v16  ;;  %v1566_v57 = vadd.f32 %v1549_v56, %v1517_v44  ;;  %v1580_v13 = vmax.f32 %v1564_v22, 0.0  ;;  %v1567_v18 = vadd.f32 %v1549_v56, %v1518_v20  ;;  %v1514_v32 = vmul.f32 %v4157_v4, %v1500_v24  ;;  %v4239_v4 = vpop.f32.mrf.mxu0 }
 0x283   :  { %v1587_v14 = vpack.c.bf16 %v1575_v46, %v1574_v58  ;;  %v1562_v43 = vadd.f32 %v1549_v56, %v1513_v0  ;;  %v135_v5 = vsub.s32 4, %v3844_v41  ;;  %3310 = vmatpush3.bf16.msra.mxu1 %v3499_v62 }
 0x284   :  { %v1582_v47 = vmax.f32 %v1566_v57, 0.0  ;;  %v1590_v6 = vpack.c.bf16 %v1581_v37, %v1580_v13  ;;  %v1583_v34 = vmax.f32 %v1567_v18, 0.0  ;;  %v1563_v19 = vadd.f32 %v1549_v56, %v1514_v32  ;;  %v678_v24 = vpop.f32.mrf.mxu0  ;;  %3311 = vmatprep.subr.bf16.mxu1 %v3500_v53 }
 0x285   :  { %v1578_v23 = vmax.f32 %v1562_v43, 0.0  ;;  %v168_v60 = vrot.slane %v4202_v1, %v135_v5 }
 0x286   :  { %v1591_v52 = vpack.c.bf16 %v1583_v34, %v1582_v47  ;;  %v1579_v50 = vmax.f32 %v1563_v19, 0.0  ;;  %v3242_v56 = vpop.f32.mrf.mxu0 }
 0x287   :  { %v4241_v7 = vadd.f32 %v678_v24, %v168_v60  ;;  %3312 = vmatpush3.bf16.msra.mxu1 %v3500_v53 }
 0x288   :  { %v1589_v63 = vpack.c.bf16 %v1579_v50, %v1578_v23  ;;  %3313 = vmatprep.subr.bf16.mxu1 %v3501_v26 }
 0x289   :  { %3296 = vmatmul.mubr.bf16.gmra.mxu0 %v1587_v14 }
 0x28a   :  { %3299 = vmatprep.mubr.bf16.mxu0 %v1588_v2 }
 0x28b   :  { %3314 = vmatpush3.bf16.msra.mxu1 %v3501_v26 }
 0x28c   :  { %3315 = vmatprep.subr.bf16.mxu1 %v3502_v61 }
 0x28f   :  { %3316 = vmatpush3.bf16.msra.mxu1 %v3502_v61 }
 0x290   :  { %3317 = vmatprep.subr.bf16.mxu1 %v3503_v29 }
 0x291   :  { %3300 = vmatmul.mubr.bf16.gmra.mxu0 %v1589_v63 }
 0x292   :  { %3303 = vmatprep.mubr.bf16.mxu0 %v1590_v6 }
 0x293   :  { %3318 = vmatpush3.bf16.msra.mxu1 %v3503_v29 }
 0x294   :  { %3319 = vmatprep.subr.bf16.mxu1 %v3504_v31 }
 0x297   :  { %3320 = vmatpush3.bf16.msra.mxu1 %v3504_v31 }
 0x298   :  { %3321 = vmatprep.subr.bf16.mxu1 %v3505_v45 }
 0x299   :  { %3304 = vmatmul.mubr.bf16.gmra.mxu0 %v1591_v52 }
 0x29b   :  { %3322 = vmatpush3.bf16.msra.mxu1 %v3505_v45 }
 0x341   :  { %v4243_v30 = vpop.f32.mrf.mxu0 }
 0x342   :  { %v1778_v33 = vmul.f32 %v4243_v30, %v4243_v30 }
 0x343   :  { %v4245_v40 = vpop.f32.mrf.mxu0 }
 0x344   :  { %v1776_v12 = vmul.f32 %v4245_v40, %v4245_v40 }
 0x345   :  { %v4247_v39 = vpop.f32.mrf.mxu0 }
 0x346   :  { %v1779_v51 = vmul.f32 %v4247_v39, %v4247_v39 }
 0x347   :  { %v4249_v25 = vpop.f32.mrf.mxu0 }
 0x348   :  { %v1754_v27 = vadd.f32 %v4249_v25, %v4245_v40  ;;  %v1777_v28 = vmul.f32 %v4249_v25, %v4249_v25 }
 0x349   :  { %v4257_v9 = vpop.f32.mrf.mxu0 }
 0x34a   :  { %v1755_v55 = vadd.f32 %v4243_v30, %v1754_v27  ;;  %v1792_v16 = vadd.f32 %v1777_v28, %v1776_v12  ;;  %v1782_v18 = vmul.f32 %v4257_v9, %v4257_v9 }
 0x34b   :  { %v4262_v36 = vpop.f32.mrf.mxu0 }
 0x34c   :  { %v1793_v42 = vadd.f32 %v1792_v16, %v1778_v33  ;;  %v1756_v35 = vadd.f32 %v4247_v39, %v1755_v55  ;;  %v1780_v22 = vmul.f32 %v4262_v36, %v4262_v36 }
 0x34d   :  { %v4267_v44 = vpop.f32.mrf.mxu0 }
 0x34e   :  { %v1757_v2 = vadd.f32 %v1756_v35, %v4262_v36  ;;  %v1794_v20 = vadd.f32 %v1793_v42, %v1779_v51  ;;  %v1783_v6 = vmul.f32 %v4267_v44, %v4267_v44 }
 0x34f   :  { %v4272_v58 = vpop.f32.mrf.mxu0 }
 0x350   :  { %v1795_v46 = vadd.f32 %v1794_v20, %v1780_v22  ;;  %v1758_v37 = vadd.f32 %v1757_v2, %v4272_v58  ;;  %v1781_v57 = vmul.f32 %v4272_v58, %v4272_v58 }
 0x351   :  { %v4277_v13 = vpop.f32.mrf.mxu0 }
 0x352   :  { %v1759_v0 = vadd.f32 %v4257_v9, %v1758_v37  ;;  %v1796_v32 = vadd.f32 %v1795_v46, %v1781_v57  ;;  %v1786_v8 = vmul.f32 %v4277_v13, %v4277_v13 }
 0x353   :  { %v4282_v47 = vpop.f32.mrf.mxu0 }
 0x354   :  { %v1797_v34 = vadd.f32 %v1796_v32, %v1782_v18  ;;  %v1760_v14 = vadd.f32 %v4267_v44, %v1759_v0  ;;  %v1784_v52 = vmul.f32 %v4282_v47, %v4282_v47 }
 0x355   :  { %v4287_v43 = vpop.f32.mrf.mxu0 }
 0x356   :  { %v1761_v19 = vadd.f32 %v1760_v14, %v4282_v47  ;;  %v1798_v23 = vadd.f32 %v1797_v34, %v1783_v6  ;;  %v1787_v61 = vmul.f32 %v4287_v43, %v4287_v43 }
 0x357   :  { %v4292_v50 = vpop.f32.mrf.mxu0 }
 0x358   :  { %v1799_v63 = vadd.f32 %v1798_v23, %v1784_v52  ;;  %v1762_v60 = vadd.f32 %v1761_v19, %v4292_v50  ;;  %v1785_v24 = vmul.f32 %v4292_v50, %v4292_v50 }
 0x359   :  { %v4297_v56 = vpop.f32.mrf.mxu0 }
 0x35a   :  { %v1763_v62 = vadd.f32 %v4277_v13, %v1762_v60  ;;  %v1800_v53 = vadd.f32 %v1799_v63, %v1785_v24  ;;  %v1790_v42 = vmul.f32 %v4297_v56, %v4297_v56 }
 0x35b   :  { %v4302_v26 = vpop.f32.mrf.mxu0 }
 0x35c   :  { %v1801_v29 = vadd.f32 %v1800_v53, %v1786_v8  ;;  %v1764_v31 = vadd.f32 %v4287_v43, %v1763_v62  ;;  %v1788_v27 = vmul.f32 %v4302_v26, %v4302_v26 }
 0x35d   :  { %v4307_v45 = vpop.f32.mrf.mxu0 }
 0x35e   :  { %v1765_v12 = vadd.f32 %v1764_v31, %v4302_v26  ;;  %v1802_v28 = vadd.f32 %v1801_v29, %v1787_v61  ;;  %v1791_v22 = vmul.f32 %v4307_v45, %v4307_v45  ;;  %v131_v31 = vsub.s32 3, %v3844_v41 }
 0x35f   :  { %v1742_v33 = vpop.f32.mrf.mxu0 }
 0x360   :  { %v1803_v55 = vadd.f32 %v1802_v28, %v1788_v27  ;;  %v1766_v16 = vadd.f32 %v1765_v12, %v1742_v33  ;;  %v1789_v51 = vmul.f32 %v1742_v33, %v1742_v33  ;;  %v4322_v12 = vld [vmem:[%s4703_s4] sm:$0xff] }
 0x361   :  { %v132_v27 = vrot.slane %v4322_v12, %v131_v31 }
 0x362   :  { %v1767_v35 = vadd.f32 %v4297_v56, %v1766_v16  ;;  %v1804_v2 = vadd.f32 %v1803_v55, %v1789_v51  ;;  %v156_v55 = vrot.slane %v4202_v1, %v123_v38 }
 0x363   :  { %v326_v28 = vadd.f32 %v4065_v48, %v132_v27 }
 0x364   :  { %v1768_v20 = vadd.f32 %v4307_v45, %v1767_v35  ;;  %v1805_v46 = vadd.f32 %v1804_v2, %v1790_v42  ;;  %v539_v42 = vadd.f32 %v4239_v4, %v156_v55 }
 0x366   :  { %v1769_v37 = vrot.slane %v1768_v20, 4  ;;  %v1806_v57 = vadd.f32 %v1805_v46, %v1791_v22 }
 0x368   :  { %v1770_v18 = vadd.f32 %v1769_v37, %v1768_v20  ;;  %v1807_v0 = vrot.slane %v1806_v57, 4 }
 0x36a   :  { %v1771_v32 = vrot.slane %v1770_v18, 2  ;;  %v1808_v6 = vadd.f32 %v1807_v0, %v1806_v57 }
 0x36c   :  { %v1772_v34 = vadd.f32 %v1771_v32, %v1770_v18  ;;  %v1809_v14 = vrot.slane %v1808_v6, 2 }
 0x36e   :  { %v1773_v19 = vrot.slane %v1772_v34, 1  ;;  %v1810_v52 = vadd.f32 %v1809_v14, %v1808_v6 }
 0x370   :  { %v1774_v23 = vadd.f32 %v1773_v19, %v1772_v34  ;;  %v1811_v63 = vrot.slane %v1810_v52, 1 }
 0x372   :  { %v1775_v60 = vmul.f32 0.0078125, %v1774_v23  ;;  %v1812_v24 = vadd.f32 %v1811_v63, %v1810_v52 }
 0x374   :  { %v1813_v8 = vmul.f32 0.0078125, %v1812_v24  ;;  %v1814_v62 = vmul.f32 %v1775_v60, %v1775_v60 }
 0x376   :  { %v1815_v53 = vsub.f32 %v1813_v8, %v1814_v62 }
 0x378   :  { %v1816_v61 = vmax.f32 %v1815_v53, 0.0 }
 0x37a   :  { %v1817_v29 = vadd.f32 1e-05, %v1816_v61 }
 0x37c   :  { %3526 = vrsqrt.f32 %v1817_v29 }
 0x389   :  { %v3527_v16 = vpop.eup %3526 }
 0x38a   :  { %v1819_v51 = vmul.f32 %v3527_v16, %v326_v28 }
 0x38c   :  { %v1820_v35 = vmul.f32 %v1819_v51, %v1775_v60  ;;  %v1829_v2 = vrot.slane %v1819_v51, %v3861_v59 }
 0x38e   :  { %v1821_v22 = vsub.f32 %v539_v42, %v1820_v35  ;;  %v1830_v20 = vcombine.high %v1829_v2, %v1829_v2  ;;  %v1837_v46 = vrot.slane %v1829_v2, %v3861_v59 }
 0x390   :  { %v1844_v37 = vrot.slane %v1830_v20, %v3861_v59  ;;  %v1848_v57 = vrot.slane %v1837_v46, %v3849_v49  ;;  %v1878_v48 = vrot.slane %v1821_v22, %v3861_v59 }
 0x392   :  { %v1852_v18 = vrot.slane %v1844_v37, %v3849_v49  ;;  %v1879_v38 = vcombine.high %v1878_v48, %v1878_v48  ;;  %v1886_v0 = vrot.slane %v1878_v48, %v3861_v59  ;;  %v1855_v4 = vmul.f32 %v1848_v57, %v4245_v40 }
 0x393   :  { %v1856_v32 = vmul.f32 %v1848_v57, %v4249_v25  ;;  %v1857_v14 = vmul.f32 %v4243_v30, %v1848_v57  ;;  %v1858_v19 = vmul.f32 %v4247_v39, %v1848_v57  ;;  %v1859_v23 = vmul.f32 %v1848_v57, %v4262_v36 }
 0x394   :  { %v1893_v6 = vrot.slane %v1879_v38, %v3861_v59  ;;  %v1897_v34 = vrot.slane %v1886_v0, %v3849_v49  ;;  %v1868_v52 = vmul.f32 %v1852_v18, %v1742_v33  ;;  %v1860_v63 = vmul.f32 %v1848_v57, %v4272_v58 }
 0x395   :  { %v1864_v60 = vmul.f32 %v1852_v18, %v4292_v50  ;;  %v1861_v29 = vmul.f32 %v4257_v9, %v1848_v57  ;;  %v1863_v33 = vmul.f32 %v1852_v18, %v4282_v47  ;;  %v1862_v50 = vmul.f32 %v4267_v44, %v1848_v57 }
 0x396   :  { %v1901_v24 = vrot.slane %v1893_v6, %v3849_v49  ;;  %v1904_v40 = vadd.f32 %v1897_v34, %v1855_v4  ;;  %v1905_v8 = vadd.f32 %v1897_v34, %v1856_v32  ;;  %v1906_v25 = vadd.f32 %v1897_v34, %v1857_v14 }
 0x397   :  { %v1907_v62 = vadd.f32 %v1897_v34, %v1858_v19  ;;  %v1908_v53 = vadd.f32 %v1897_v34, %v1859_v23  ;;  %v1909_v61 = vadd.f32 %v1897_v34, %v1860_v63  ;;  %v1910_v2 = vadd.f32 %v1897_v34, %v1861_v29  ;;  %v3513_v29 = vld [vmem:[#allocation5 + $0xc0] sm:$0xff]  }
 0x398   :  { %v1920_v30 = vmax.f32 %v1904_v40, 0.0  ;;  %v1921_v27 = vmax.f32 %v1905_v8, 0.0  ;;  %v1922_v39 = vmax.f32 %v1906_v25, 0.0  ;;  %v1917_v55 = vadd.f32 %v1901_v24, %v1868_v52 }
 0x399   :  { %v1923_v36 = vmax.f32 %v1907_v62, 0.0  ;;  %v1924_v28 = vmax.f32 %v1908_v53, 0.0  ;;  %v1925_v58 = vmax.f32 %v1909_v61, 0.0  ;;  %v1912_v51 = vadd.f32 %v1901_v24, %v1863_v33  ;;  %v3506_v62 = vld [vmem:[#allocation5 + $0xf8] sm:$0xff]   ;;  %v3511_v53 = vld [vmem:[#allocation5 + $0xd0] sm:$0xff]   ;;  %v3512_v61 = vld [vmem:[#allocation5 + $0xc8] sm:$0xff]  }
 0x39a   :  { %v1936_v16 = vpack.c.bf16 %v1921_v27, %v1920_v30  ;;  %v1913_v42 = vadd.f32 %v1901_v24, %v1864_v60  ;;  %v1911_v22 = vadd.f32 %v1897_v34, %v1862_v50  ;;  %v1867_v37 = vmul.f32 %v1852_v18, %v4302_v26  ;;  %3339 = vmatprep.subr.bf16.mxu0 %v3506_v62 }
 0x39b   :  { %v1937_v35 = vpack.c.bf16 %v1923_v36, %v1922_v39  ;;  %v1938_v20 = vpack.c.bf16 %v1925_v58, %v1924_v28  ;;  %v1928_v9 = vmax.f32 %v1912_v51, 0.0  ;;  %v1869_v47 = vmul.f32 %v4297_v56, %v1852_v18  ;;  %3340 = vmatpush3.bf16.msra.mxu0 %v3506_v62 }
 0x39c   :  { %3323 = vmatprep.mubr.bf16.mxu1 %v1936_v16  ;;  %v1929_v46 = vmax.f32 %v1913_v42, 0.0  ;;  %v1916_v38 = vadd.f32 %v1901_v24, %v1867_v37  ;;  %v1933_v44 = vmax.f32 %v1917_v55, 0.0  ;;  %v1870_v57 = vmul.f32 %v4307_v45, %v1852_v18 }
 0x39d   :  { %3324 = vmatmul.mubr.bf16.vlgmr.msra.gmra.mxu1 %v1937_v35  ;;  %v1926_v0 = vmax.f32 %v1910_v2, 0.0  ;;  %v1927_v4 = vmax.f32 %v1911_v22, 0.0  ;;  %v1918_v32 = vadd.f32 %v1901_v24, %v1869_v47  ;;  %v1865_v14 = vmul.f32 %v4277_v13, %v1852_v18  ;;  %v3507_v13 = vld [vmem:[#allocation5 + $0xf0] sm:$0xff]  }
 0x39e   :  { %3327 = vmatprep.mubr.bf16.mxu1 %v1938_v20  ;;  %v1940_v48 = vpack.c.bf16 %v1929_v46, %v1928_v9  ;;  %v1932_v6 = vmax.f32 %v1916_v38, 0.0  ;;  %v1919_v34 = vadd.f32 %v1901_v24, %v1870_v57  ;;  %v1866_v19 = vmul.f32 %v4287_v43, %v1852_v18  ;;  %3341 = vmatprep.subr.bf16.mxu0 %v3507_v13  ;;  %v3508_v43 = vld [vmem:[#allocation5 + $0xe8] sm:$0xff]   ;;  %v3509_v18 = vld [vmem:[#allocation5 + $0xe0] sm:$0xff]  }
 0x39f   :  { %v1934_v52 = vmax.f32 %v1918_v32, 0.0  ;;  %v1939_v63 = vpack.c.bf16 %v1927_v4, %v1926_v0  ;;  %v1914_v56 = vadd.f32 %v1901_v24, %v1865_v14  ;;  %3342 = vmatpush3.bf16.msra.mxu0 %v3507_v13 }
 0x3a0   :  { %v1942_v26 = vpack.c.bf16 %v1933_v44, %v1932_v6  ;;  %v1935_v23 = vmax.f32 %v1919_v34, 0.0  ;;  %v1915_v60 = vadd.f32 %v1901_v24, %v1866_v19  ;;  %3343 = vmatprep.subr.bf16.mxu0 %v3508_v43  ;;  %v3510_v24 = vld [vmem:[#allocation5 + $0xd8] sm:$0xff]  }
 0x3a1   :  { %v1930_v8 = vmax.f32 %v1914_v56, 0.0 }
 0x3a2   :  { %v1943_v40 = vpack.c.bf16 %v1935_v23, %v1934_v52  ;;  %v1931_v45 = vmax.f32 %v1915_v60, 0.0 }
 0x3a3   :  { %3344 = vmatpush3.bf16.msra.mxu0 %v3508_v43 }
 0x3a4   :  { %v1941_v25 = vpack.c.bf16 %v1931_v45, %v1930_v8  ;;  %3345 = vmatprep.subr.bf16.mxu0 %v3509_v18 }
 0x3a5   :  { %3328 = vmatmul.mubr.bf16.gmra.mxu1 %v1939_v63 }
 0x3a6   :  { %3331 = vmatprep.mubr.bf16.mxu1 %v1940_v48 }
 0x3a7   :  { %3346 = vmatpush3.bf16.msra.mxu0 %v3509_v18 }
 0x3a8   :  { %3347 = vmatprep.subr.bf16.mxu0 %v3510_v24 }
 0x3ab   :  { %3348 = vmatpush3.bf16.msra.mxu0 %v3510_v24 }
 0x3ac   :  { %3349 = vmatprep.subr.bf16.mxu0 %v3511_v53 }
 0x3ad   :  { %3332 = vmatmul.mubr.bf16.gmra.mxu1 %v1941_v25 }
 0x3ae   :  { %3335 = vmatprep.mubr.bf16.mxu1 %v1942_v26 }
 0x3af   :  { %3350 = vmatpush3.bf16.msra.mxu0 %v3511_v53 }
 0x3b0   :  { %3351 = vmatprep.subr.bf16.mxu0 %v3512_v61 }
 0x3b3   :  { %3352 = vmatpush3.bf16.msra.mxu0 %v3512_v61 }
 0x3b4   :  { %3353 = vmatprep.subr.bf16.mxu0 %v3513_v29 }
 0x3b5   :  { %3336 = vmatmul.mubr.bf16.gmra.mxu1 %v1943_v40 }
 0x3b7   :  { %3354 = vmatpush3.bf16.msra.mxu0 %v3513_v29 }
 0x3b8   :  { %3403 = vmatprep.subr.mxu0 %v3590_v3 }
 0x45d   :  { %v4358_v30 = vpop.f32.mrf.mxu1 }
 0x45e   :  { %v2130_v55 = vmul.f32 %v4358_v30, %v4358_v30 }
 0x45f   :  { %v4360_v27 = vpop.f32.mrf.mxu1 }
 0x460   :  { %v2128_v36 = vmul.f32 %v4360_v27, %v4360_v27 }
 0x461   :  { %v4362_v39 = vpop.f32.mrf.mxu1 }
 0x462   :  { %v2131_v35 = vmul.f32 %v4362_v39, %v4362_v39 }
 0x463   :  { %v4364_v33 = vpop.f32.mrf.mxu1 }
 0x464   :  { %v2106_v28 = vadd.f32 %v4364_v33, %v4360_v27  ;;  %v2129_v58 = vmul.f32 %v4364_v33, %v4364_v33 }
 0x465   :  { %v4372_v50 = vpop.f32.mrf.mxu1 }
 0x466   :  { %v2107_v16 = vadd.f32 %v4358_v30, %v2106_v28  ;;  %v2144_v51 = vadd.f32 %v2129_v58, %v2128_v36  ;;  %v2134_v0 = vmul.f32 %v4372_v50, %v4372_v50 }
 0x467   :  { %v4377_v42 = vpop.f32.mrf.mxu1 }
 0x468   :  { %v2145_v2 = vadd.f32 %v2144_v51, %v2130_v55  ;;  %v2108_v22 = vadd.f32 %v4362_v39, %v2107_v16  ;;  %v2132_v46 = vmul.f32 %v4377_v42, %v4377_v42 }
 0x469   :  { %v4382_v20 = vpop.f32.mrf.mxu1 }
 0x46a   :  { %v2109_v9 = vadd.f32 %v2108_v22, %v4377_v42  ;;  %v2146_v37 = vadd.f32 %v2145_v2, %v2131_v35  ;;  %v2135_v34 = vmul.f32 %v4382_v20, %v4382_v20 }
 0x46b   :  { %v4387_v47 = vpop.f32.mrf.mxu1 }
 0x46c   :  { %v2147_v48 = vadd.f32 %v2146_v37, %v2132_v46  ;;  %v2110_v38 = vadd.f32 %v2109_v9, %v4387_v47  ;;  %v2133_v44 = vmul.f32 %v4387_v47, %v4387_v47 }
 0x46d   :  { %v4392_v57 = vpop.f32.mrf.mxu1 }
 0x46e   :  { %v2111_v4 = vadd.f32 %v4372_v50, %v2110_v38  ;;  %v2148_v32 = vadd.f32 %v2147_v48, %v2133_v44  ;;  %v2138_v25 = vmul.f32 %v4392_v57, %v4392_v57 }
 0x46f   :  { %v4397_v6 = vpop.f32.mrf.mxu1 }
 0x470   :  { %v2149_v14 = vadd.f32 %v2148_v32, %v2134_v0  ;;  %v2112_v19 = vadd.f32 %v4382_v20, %v2111_v4  ;;  %v2136_v23 = vmul.f32 %v4397_v6, %v4397_v6 }
 0x471   :  { %v4402_v52 = vpop.f32.mrf.mxu1 }
 0x472   :  { %v2113_v26 = vadd.f32 %v2112_v19, %v4397_v6  ;;  %v2150_v63 = vadd.f32 %v2149_v14, %v2135_v34  ;;  %v2139_v18 = vmul.f32 %v4402_v52, %v4402_v52 }
 0x473   :  { %v4407_v56 = vpop.f32.mrf.mxu1 }
 0x474   :  { %v2151_v60 = vadd.f32 %v2150_v63, %v2136_v23  ;;  %v2114_v40 = vadd.f32 %v2113_v26, %v4407_v56  ;;  %v2137_v8 = vmul.f32 %v4407_v56, %v4407_v56 }
 0x475   :  { %v4412_v45 = vpop.f32.mrf.mxu1 }
 0x476   :  { %v2115_v62 = vadd.f32 %v4392_v57, %v2114_v40  ;;  %v2152_v13 = vadd.f32 %v2151_v60, %v2137_v8  ;;  %v2142_v35 = vmul.f32 %v4412_v45, %v4412_v45 }
 0x477   :  { %v4417_v43 = vpop.f32.mrf.mxu1 }
 0x478   :  { %v2153_v24 = vadd.f32 %v2152_v13, %v2138_v25  ;;  %v2116_v53 = vadd.f32 %v4402_v52, %v2115_v62  ;;  %v2140_v36 = vmul.f32 %v4417_v43, %v4417_v43 }
 0x479   :  { %v4422_v61 = vpop.f32.mrf.mxu1 }
 0x47a   :  { %v2117_v29 = vadd.f32 %v2116_v53, %v4417_v43  ;;  %v2154_v28 = vadd.f32 %v2153_v24, %v2139_v18  ;;  %v2143_v9 = vmul.f32 %v4422_v61, %v4422_v61  ;;  %v136_v24 = vrot.slane %v4322_v12, %v135_v5 }
 0x47b   :  { %v2094_v58 = vpop.f32.mrf.mxu1  ;;  %v160_v53 = vrot.slane %v4202_v1, %v127_v17 }
 0x47c   :  { %v2155_v55 = vadd.f32 %v2154_v28, %v2140_v36  ;;  %v2118_v16 = vadd.f32 %v2117_v29, %v2094_v58  ;;  %v2141_v51 = vmul.f32 %v2094_v58, %v2094_v58  ;;  %v395_v29 = vadd.f32 %v4194_v21, %v136_v24 }
 0x47e   :  { %v2119_v2 = vadd.f32 %v4412_v45, %v2118_v16  ;;  %v2156_v22 = vadd.f32 %v2155_v55, %v2141_v51  ;;  %v608_v55 = vadd.f32 %v4109_v10, %v160_v53 }
 0x480   :  { %v2120_v46 = vadd.f32 %v4422_v61, %v2119_v2  ;;  %v2157_v37 = vadd.f32 %v2156_v22, %v2142_v35 }
 0x482   :  { %v2121_v48 = vrot.slane %v2120_v46, 4  ;;  %v2158_v38 = vadd.f32 %v2157_v37, %v2143_v9 }
 0x484   :  { %v2122_v44 = vadd.f32 %v2121_v48, %v2120_v46  ;;  %v2159_v0 = vrot.slane %v2158_v38, 4 }
 0x486   :  { %v2123_v4 = vrot.slane %v2122_v44, 2  ;;  %v2160_v32 = vadd.f32 %v2159_v0, %v2158_v38 }
 0x488   :  { %v2124_v34 = vadd.f32 %v2123_v4, %v2122_v44  ;;  %v2161_v14 = vrot.slane %v2160_v32, 2 }
 0x48a   :  { %v2125_v19 = vrot.slane %v2124_v34, 1  ;;  %v2162_v26 = vadd.f32 %v2161_v14, %v2160_v32 }
 0x48c   :  { %v2126_v23 = vadd.f32 %v2125_v19, %v2124_v34  ;;  %v2163_v63 = vrot.slane %v2162_v26, 1 }
 0x48e   :  { %v2127_v60 = vmul.f32 0.0078125, %v2126_v23  ;;  %v2164_v40 = vadd.f32 %v2163_v63, %v2162_v26 }
 0x490   :  { %v2165_v8 = vmul.f32 0.0078125, %v2164_v40  ;;  %v2166_v25 = vmul.f32 %v2127_v60, %v2127_v60 }
 0x492   :  { %v2167_v62 = vsub.f32 %v2165_v8, %v2166_v25 }
 0x494   :  { %v2168_v13 = vmax.f32 %v2167_v62, 0.0 }
 0x496   :  { %v2169_v18 = vadd.f32 1e-05, %v2168_v13 }
 0x498   :  { %3528 = vrsqrt.f32 %v2169_v18 }
 0x4a5   :  { %v3529_v36 = vpop.eup %3528 }
 0x4a6   :  { %v2171_v28 = vmul.f32 %v3529_v36, %v395_v29 }
 0x4a8   :  { %v2172_v16 = vmul.f32 %v2171_v28, %v2127_v60  ;;  %v2181_v51 = vrot.slane %v2171_v28, %v3861_v59 }
 0x4aa   :  { %v2173_v35 = vsub.f32 %v608_v55, %v2172_v16  ;;  %v2182_v2 = vcombine.high %v2181_v51, %v2181_v51  ;;  %v2189_v22 = vrot.slane %v2181_v51, %v3861_v59 }
 0x4ac   :  { %v2196_v9 = vrot.slane %v2182_v2, %v3861_v59  ;;  %v2200_v5 = vrot.slane %v2189_v22, %v3849_v49  ;;  %v2230_v46 = vrot.slane %v2173_v35, %v3861_v59 }
 0x4ae   :  { %v2204_v17 = vrot.slane %v2196_v9, %v3849_v49  ;;  %v2231_v21 = vcombine.high %v2230_v46, %v2230_v46  ;;  %v2238_v1 = vrot.slane %v2230_v46, %v3861_v59  ;;  %v2207_v10 = vmul.f32 %v2200_v5, %v4360_v27 }
 0x4af   :  { %v2208_v37 = vmul.f32 %v2200_v5, %v4364_v33  ;;  %v2209_v48 = vmul.f32 %v4358_v30, %v2200_v5  ;;  %v2210_v38 = vmul.f32 %v4362_v39, %v2200_v5  ;;  %v2211_v44 = vmul.f32 %v2200_v5, %v4377_v42 }
 0x4b0   :  { %v2220_v0 = vmul.f32 %v2204_v17, %v2094_v58  ;;  %v2245_v4 = vrot.slane %v2231_v21, %v3861_v59  ;;  %v2249_v32 = vrot.slane %v2238_v1, %v3849_v49  ;;  %v2212_v34 = vmul.f32 %v2200_v5, %v4387_v47 }
 0x4b1   :  { %v2213_v14 = vmul.f32 %v4372_v50, %v2200_v5  ;;  %v2214_v19 = vmul.f32 %v4382_v20, %v2200_v5  ;;  %v2215_v27 = vmul.f32 %v2204_v17, %v4397_v6  ;;  %v2216_v33 = vmul.f32 %v2204_v17, %v4407_v56 }
 0x4b2   :  { %v2253_v30 = vrot.slane %v2245_v4, %v3849_v49  ;;  %v2256_v39 = vadd.f32 %v2249_v32, %v2207_v10  ;;  %v2257_v26 = vadd.f32 %v2249_v32, %v2208_v37  ;;  %v2258_v42 = vadd.f32 %v2249_v32, %v2209_v48 }
 0x4b3   :  { %v2259_v58 = vadd.f32 %v2249_v32, %v2210_v38  ;;  %v2260_v23 = vadd.f32 %v2249_v32, %v2211_v44  ;;  %v2261_v63 = vadd.f32 %v2249_v32, %v2212_v34  ;;  %v2262_v60 = vadd.f32 %v2249_v32, %v2213_v14  ;;  %v3517_v34 = vld [vmem:[#allocation5 + $0x120] sm:$0xff]   ;;  %v3518_v14 = vld [vmem:[#allocation5 + $0x118] sm:$0xff]  }
 0x4b4   :  { %v2269_v40 = vadd.f32 %v2253_v30, %v2220_v0  ;;  %v2272_v8 = vmax.f32 %v2256_v39, 0.0  ;;  %v2273_v47 = vmax.f32 %v2257_v26, 0.0  ;;  %v2274_v25 = vmax.f32 %v2258_v42, 0.0 }
 0x4b5   :  { %v2275_v50 = vmax.f32 %v2259_v58, 0.0  ;;  %v2276_v62 = vmax.f32 %v2260_v23, 0.0  ;;  %v2277_v20 = vmax.f32 %v2261_v63, 0.0  ;;  %v2263_v13 = vadd.f32 %v2249_v32, %v2214_v19  ;;  %v3519_v19 = vld [vmem:[#allocation5 + $0x110] sm:$0xff]  }
 0x4b6   :  { %v2288_v6 = vpack.c.bf16 %v2273_v47, %v2272_v8  ;;  %v2278_v18 = vmax.f32 %v2262_v60, 0.0  ;;  %v2264_v56 = vadd.f32 %v2253_v30, %v2215_v27  ;;  %v2265_v24 = vadd.f32 %v2253_v30, %v2216_v33  ;;  %v3520_v27 = vld [vmem:[#allocation5 + $0x108] sm:$0xff]   ;;  %v3521_v33 = vld [vmem:[#allocation5 + $0x100] sm:$0xff]  }
 0x4b7   :  { %v2289_v53 = vpack.c.bf16 %v2275_v50, %v2274_v25  ;;  %v2290_v29 = vpack.c.bf16 %v2277_v20, %v2276_v62  ;;  %v2279_v36 = vmax.f32 %v2263_v13, 0.0  ;;  %v2217_v28 = vmul.f32 %v4392_v57, %v2204_v17 }
 0x4b8   :  { %3355 = vmatprep.mubr.bf16.mxu0 %v2288_v6  ;;  %v2280_v55 = vmax.f32 %v2264_v56, 0.0  ;;  %v2281_v16 = vmax.f32 %v2265_v24, 0.0  ;;  %v2218_v51 = vmul.f32 %v4402_v52, %v2204_v17  ;;  %v2219_v35 = vmul.f32 %v2204_v17, %v4417_v43 }
 0x4b9   :  { %3356 = vmatmul.mubr.bf16.vlgmr.msra.gmra.mxu0 %v2289_v53  ;;  %v2291_v2 = vpack.c.bf16 %v2279_v36, %v2278_v18  ;;  %v2266_v22 = vadd.f32 %v2253_v30, %v2217_v28  ;;  %v2285_v9 = vmax.f32 %v2269_v40, 0.0  ;;  %v2221_v5 = vmul.f32 %v4412_v45, %v2204_v17  ;;  %v3514_v45 = vld [vmem:[#allocation5 + $0x138] sm:$0xff]  }
 0x4ba   :  { %3359 = vmatprep.mubr.bf16.mxu0 %v2290_v29  ;;  %v2292_v46 = vpack.c.bf16 %v2281_v16, %v2280_v55  ;;  %v2267_v21 = vadd.f32 %v2253_v30, %v2218_v51  ;;  %v2268_v1 = vadd.f32 %v2253_v30, %v2219_v35  ;;  %v2222_v10 = vmul.f32 %v4422_v61, %v2204_v17  ;;  %v3515_v61 = vld [vmem:[#allocation5 + $0x130] sm:$0xff]   ;;  %v3516_v17 = vld [vmem:[#allocation5 + $0x128] sm:$0xff]  }
 0x4bb   :  { %v2282_v57 = vmax.f32 %v2266_v22, 0.0  ;;  %v2270_v37 = vadd.f32 %v2253_v30, %v2221_v5  ;;  %3371 = vmatprep.subr.bf16.mxu1 %v3514_v45 }
 0x4bc   :  { %v2283_v48 = vmax.f32 %v2267_v21, 0.0  ;;  %v2284_v38 = vmax.f32 %v2268_v1, 0.0  ;;  %v2271_v44 = vadd.f32 %v2253_v30, %v2222_v10  ;;  %3372 = vmatpush3.bf16.msra.mxu1 %v3514_v45 }
 0x4bd   :  { %v2286_v52 = vmax.f32 %v2270_v37, 0.0  ;;  %3373 = vmatprep.subr.bf16.mxu1 %v3515_v61 }
 0x4be   :  { %v2293_v0 = vpack.c.bf16 %v2283_v48, %v2282_v57  ;;  %v2294_v43 = vpack.c.bf16 %v2285_v9, %v2284_v38  ;;  %v2287_v4 = vmax.f32 %v2271_v44, 0.0 }
 0x4c0   :  { %v2295_v32 = vpack.c.bf16 %v2287_v4, %v2286_v52  ;;  %3374 = vmatpush3.bf16.msra.mxu1 %v3515_v61 }
 0x4c1   :  { %3360 = vmatmul.mubr.bf16.gmra.mxu0 %v2291_v2  ;;  %3375 = vmatprep.subr.bf16.mxu1 %v3516_v17 }
 0x4c2   :  { %3363 = vmatprep.mubr.bf16.mxu0 %v2292_v46 }
 0x4c4   :  { %3376 = vmatpush3.bf16.msra.mxu1 %v3516_v17 }
 0x4c5   :  { %3377 = vmatprep.subr.bf16.mxu1 %v3517_v34 }
 0x4c8   :  { %3378 = vmatpush3.bf16.msra.mxu1 %v3517_v34 }
 0x4c9   :  { %3364 = vmatmul.mubr.bf16.gmra.mxu0 %v2293_v0  ;;  %3379 = vmatprep.subr.bf16.mxu1 %v3518_v14 }
 0x4ca   :  { %3367 = vmatprep.mubr.bf16.mxu0 %v2294_v43 }
 0x4cc   :  { %3380 = vmatpush3.bf16.msra.mxu1 %v3518_v14 }
 0x4cd   :  { %3381 = vmatprep.subr.bf16.mxu1 %v3519_v19 }
 0x4d0   :  { %3382 = vmatpush3.bf16.msra.mxu1 %v3519_v19 }
 0x4d1   :  { %3368 = vmatmul.mubr.bf16.gmra.mxu0 %v2295_v32  ;;  %3383 = vmatprep.subr.bf16.mxu1 %v3520_v27 }
 0x4d2   :  { %3435 = vmatprep.mubr.msk.f32.mxu0 %vm3593_vm1, %v3590_v3 }
 0x4d4   :  { %3384 = vmatpush3.bf16.msra.mxu1 %v3520_v27 }
 0x4d5   :  { %3385 = vmatprep.subr.bf16.mxu1 %v3521_v33 }
 0x4d8   :  { %3386 = vmatpush3.bf16.msra.mxu1 %v3521_v33 }
 0x579   :  { %v4468_v30 = vpop.f32.mrf.mxu0 }
 0x57a   :  { %v2482_v40 = vmul.f32 %v4468_v30, %v4468_v30 }
 0x57b   :  { %v4470_v39 = vpop.f32.mrf.mxu0 }
 0x57c   :  { %v2480_v58 = vmul.f32 %v4470_v39, %v4470_v39 }
 0x57d   :  { %v4472_v26 = vpop.f32.mrf.mxu0 }
 0x57e   :  { %v2483_v50 = vmul.f32 %v4472_v26, %v4472_v26 }
 0x57f   :  { %v4474_v42 = vpop.f32.mrf.mxu0 }
 0x580   :  { %v2458_v23 = vadd.f32 %v4474_v42, %v4470_v39  ;;  %v2481_v63 = vmul.f32 %v4474_v42, %v4474_v42 }
 0x581   :  { %v4482_v60 = vpop.f32.mrf.mxu0 }
 0x582   :  { %v2459_v8 = vadd.f32 %v4468_v30, %v2458_v23  ;;  %v2496_v47 = vadd.f32 %v2481_v63, %v2480_v58  ;;  %v2486_v55 = vmul.f32 %v4482_v60, %v4482_v60 }
 0x583   :  { %v4487_v25 = vpop.f32.mrf.mxu0 }
 0x584   :  { %v2497_v62 = vadd.f32 %v2496_v47, %v2482_v40  ;;  %v2460_v20 = vadd.f32 %v4472_v26, %v2459_v8  ;;  %v2484_v18 = vmul.f32 %v4487_v25, %v4487_v25 }
 0x585   :  { %v4492_v13 = vpop.f32.mrf.mxu0 }
 0x586   :  { %v2461_v6 = vadd.f32 %v2460_v20, %v4487_v25  ;;  %v2498_v56 = vadd.f32 %v2497_v62, %v2483_v50  ;;  %v2487_v2 = vmul.f32 %v4492_v13, %v4492_v13 }
 0x587   :  { %v4497_v24 = vpop.f32.mrf.mxu0 }
 0x588   :  { %v2499_v53 = vadd.f32 %v2498_v56, %v2484_v18  ;;  %v2462_v29 = vadd.f32 %v2461_v6, %v4497_v24  ;;  %v2485_v36 = vmul.f32 %v4497_v24, %v4497_v24 }
 0x589   :  { %v4502_v28 = vpop.f32.mrf.mxu0 }
 0x58a   :  { %v2463_v16 = vadd.f32 %v4482_v60, %v2462_v29  ;;  %v2500_v51 = vadd.f32 %v2499_v53, %v2485_v36  ;;  %v2490_v44 = vmul.f32 %v4502_v28, %v4502_v28 }
 0x58b   :  { %v4507_v35 = vpop.f32.mrf.mxu0 }
 0x58c   :  { %v2501_v22 = vadd.f32 %v2500_v51, %v2486_v55  ;;  %v2464_v9 = vadd.f32 %v4492_v13, %v2463_v16  ;;  %v2488_v21 = vmul.f32 %v4507_v35, %v4507_v35 }
 0x58d   :  { %v4512_v5 = vpop.f32.mrf.mxu0 }
 0x58e   :  { %v2465_v46 = vadd.f32 %v2464_v9, %v4507_v35  ;;  %v2502_v1 = vadd.f32 %v2501_v22, %v2487_v2  ;;  %v2491_v4 = vmul.f32 %v4512_v5, %v4512_v5 }
 0x58f   :  { %v4517_v10 = vpop.f32.mrf.mxu0 }
 0x590   :  { %v2503_v57 = vadd.f32 %v2502_v1, %v2488_v21  ;;  %v2466_v37 = vadd.f32 %v2465_v46, %v4517_v10  ;;  %v2489_v48 = vmul.f32 %v4517_v10, %v4517_v10 }
 0x591   :  { %v4522_v38 = vpop.f32.mrf.mxu0 }
 0x592   :  { %v2467_v52 = vadd.f32 %v4502_v28, %v2466_v37  ;;  %v2504_v0 = vadd.f32 %v2503_v57, %v2489_v48  ;;  %v2494_v23 = vmul.f32 %v4522_v38, %v4522_v38  ;;  %v139_v48 = vsub.s32 5, %v3844_v41 }
 0x593   :  { %v4527_v43 = vpop.f32.mrf.mxu0 }
 0x594   :  { %v2505_v32 = vadd.f32 %v2504_v0, %v2490_v44  ;;  %v2468_v45 = vadd.f32 %v4512_v5, %v2467_v52  ;;  %v2492_v34 = vmul.f32 %v4527_v43, %v4527_v43  ;;  %v140_v44 = vrot.slane %v4322_v12, %v139_v48  ;;  %v3536_v52 = vld [vmem:[%s4703_s4 + $0x8] sm:$0x1f] }
 0x595   :  { %v4532_v61 = vpop.f32.mrf.mxu0  ;;  %v164_v0 = vrot.slane %v3536_v52, %v131_v31 }
 0x596   :  { %v2469_v17 = vadd.f32 %v2468_v45, %v4527_v43  ;;  %v2506_v14 = vadd.f32 %v2505_v32, %v2491_v4  ;;  %v2495_v8 = vmul.f32 %v4532_v61, %v4532_v61  ;;  %v397_v4 = vadd.f32 %v4206_v54, %v140_v44 }
 0x597   :  { %v2446_v19 = vpop.f32.mrf.mxu0 }
 0x598   :  { %v2507_v27 = vadd.f32 %v2506_v14, %v2492_v34  ;;  %v2470_v33 = vadd.f32 %v2469_v17, %v2446_v19  ;;  %v2493_v58 = vmul.f32 %v2446_v19, %v2446_v19  ;;  %v610_v17 = vadd.f32 %v4111_v11, %v164_v0 }
 0x59a   :  { %v2471_v63 = vadd.f32 %v4522_v38, %v2470_v33  ;;  %v2508_v40 = vadd.f32 %v2507_v27, %v2493_v58 }
 0x59c   :  { %v2472_v47 = vadd.f32 %v4532_v61, %v2471_v63  ;;  %v2509_v50 = vadd.f32 %v2508_v40, %v2494_v23 }
 0x59e   :  { %v2473_v62 = vrot.slane %v2472_v47, 4  ;;  %v2510_v20 = vadd.f32 %v2509_v50, %v2495_v8 }
 0x5a0   :  { %v2474_v6 = vadd.f32 %v2473_v62, %v2472_v47  ;;  %v2511_v18 = vrot.slane %v2510_v20, 4 }
 0x5a2   :  { %v2475_v56 = vrot.slane %v2474_v6, 2  ;;  %v2512_v53 = vadd.f32 %v2511_v18, %v2510_v20 }
 0x5a4   :  { %v2476_v29 = vadd.f32 %v2475_v56, %v2474_v6  ;;  %v2513_v36 = vrot.slane %v2512_v53, 2 }
 0x5a6   :  { %v2477_v55 = vrot.slane %v2476_v29, 1  ;;  %v2514_v16 = vadd.f32 %v2513_v36, %v2512_v53 }
 0x5a8   :  { %v2478_v51 = vadd.f32 %v2477_v55, %v2476_v29  ;;  %v2515_v2 = vrot.slane %v2514_v16, 1 }
 0x5aa   :  { %v2479_v22 = vmul.f32 0.0078125, %v2478_v51  ;;  %v2516_v9 = vadd.f32 %v2515_v2, %v2514_v16 }
 0x5ac   :  { %v2517_v46 = vmul.f32 0.0078125, %v2516_v9  ;;  %v2518_v21 = vmul.f32 %v2479_v22, %v2479_v22 }
 0x5ae   :  { %v2519_v1 = vsub.f32 %v2517_v46, %v2518_v21 }
 0x5b0   :  { %v2520_v57 = vmax.f32 %v2519_v1, 0.0 }
 0x5b2   :  { %v2521_v37 = vadd.f32 1e-05, %v2520_v57 }
 0x5b4   :  { %3530 = vrsqrt.f32 %v2521_v37 }
 0x5c1   :  { %v3531_v32 = vpop.eup %3530 }
 0x5c2   :  { %v2523_v45 = vmul.f32 %v3531_v32, %v397_v4 }
 0x5c4   :  { %v2524_v34 = vmul.f32 %v2523_v45, %v2479_v22  ;;  %v2533_v14 = vrot.slane %v2523_v45, %v3861_v59 }
 0x5c6   :  { %v2525_v27 = vsub.f32 %v610_v17, %v2524_v34  ;;  %v2534_v33 = vcombine.high %v2533_v14, %v2533_v14  ;;  %v2541_v12 = vrot.slane %v2533_v14, %v3861_v59 }
 0x5c8   :  { %v2548_v58 = vrot.slane %v2534_v33, %v3861_v59  ;;  %v2552_v23 = vrot.slane %v2541_v12, %v3849_v49  ;;  %v2582_v63 = vrot.slane %v2525_v27, %v3861_v59 }
 0x5ca   :  { %v2556_v31 = vrot.slane %v2548_v58, %v3849_v49  ;;  %v2583_v54 = vcombine.high %v2582_v63, %v2582_v63  ;;  %v2590_v40 = vrot.slane %v2582_v63, %v3861_v59  ;;  %v2559_v11 = vmul.f32 %v2552_v23, %v4470_v39 }
 0x5cb   :  { %v2560_v8 = vmul.f32 %v2552_v23, %v4474_v42  ;;  %v2561_v62 = vmul.f32 %v4468_v30, %v2552_v23  ;;  %v2562_v20 = vmul.f32 %v4472_v26, %v2552_v23  ;;  %v2563_v18 = vmul.f32 %v2552_v23, %v4487_v25 }
 0x5cc   :  { %v2597_v47 = vrot.slane %v2583_v54, %v3861_v59  ;;  %v2601_v50 = vrot.slane %v2590_v40, %v3849_v49  ;;  %v2572_v6 = vmul.f32 %v2556_v31, %v2446_v19  ;;  %v2564_v56 = vmul.f32 %v2552_v23, %v4497_v24 }
 0x5cd   :  { %v2568_v53 = vmul.f32 %v2556_v31, %v4517_v10  ;;  %v2565_v2 = vmul.f32 %v4482_v60, %v2552_v23  ;;  %v2567_v19 = vmul.f32 %v2556_v31, %v4507_v35  ;;  %v2566_v10 = vmul.f32 %v4492_v13, %v2552_v23 }
 0x5ce   :  { %v2605_v29 = vrot.slane %v2597_v47, %v3849_v49  ;;  %v2608_v39 = vadd.f32 %v2601_v50, %v2559_v11  ;;  %v2609_v36 = vadd.f32 %v2601_v50, %v2560_v8  ;;  %v2610_v42 = vadd.f32 %v2601_v50, %v2561_v62 }
 0x5cf   :  { %v2611_v55 = vadd.f32 %v2601_v50, %v2562_v20  ;;  %v2612_v16 = vadd.f32 %v2601_v50, %v2563_v18  ;;  %v2613_v51 = vadd.f32 %v2601_v50, %v2564_v56  ;;  %v2614_v48 = vadd.f32 %v2601_v50, %v2565_v2 }
 0x5d0   :  { %v2624_v30 = vmax.f32 %v2608_v39, 0.0  ;;  %v2625_v22 = vmax.f32 %v2609_v36, 0.0  ;;  %v2626_v26 = vmax.f32 %v2610_v42, 0.0  ;;  %v2621_v46 = vadd.f32 %v2605_v29, %v2572_v6 }
 0x5d1   :  { %v2627_v25 = vmax.f32 %v2611_v55, 0.0  ;;  %v2628_v9 = vmax.f32 %v2612_v16, 0.0  ;;  %v2629_v24 = vmax.f32 %v2613_v51, 0.0  ;;  %v2616_v1 = vadd.f32 %v2605_v29, %v2567_v19 }
 0x5d2   :  { %v2640_v21 = vpack.c.bf16 %v2625_v22, %v2624_v30  ;;  %v2617_v57 = vadd.f32 %v2605_v29, %v2568_v53  ;;  %v2615_v44 = vadd.f32 %v2601_v50, %v2566_v10  ;;  %v2571_v4 = vmul.f32 %v2556_v31, %v4527_v43 }
 0x5d3   :  { %v2641_v37 = vpack.c.bf16 %v2627_v25, %v2626_v26  ;;  %v2642_v52 = vpack.c.bf16 %v2629_v24, %v2628_v9  ;;  %v2632_v60 = vmax.f32 %v2616_v1, 0.0  ;;  %v2573_v35 = vmul.f32 %v4522_v38, %v2556_v31 }
 0x5d4   :  { %3387 = vmatprep.mubr.bf16.mxu1 %v2640_v21  ;;  %v2633_v0 = vmax.f32 %v2617_v57, 0.0  ;;  %v2620_v45 = vadd.f32 %v2605_v29, %v2571_v4  ;;  %v2637_v13 = vmax.f32 %v2621_v46, 0.0  ;;  %v2574_v17 = vmul.f32 %v4532_v61, %v2556_v31 }
 0x5d5   :  { %3388 = vmatmul.mubr.bf16.vlgmr.msra.gmra.mxu1 %v2641_v37  ;;  %v2630_v34 = vmax.f32 %v2614_v48, 0.0  ;;  %v2631_v14 = vmax.f32 %v2615_v44, 0.0  ;;  %v2622_v27 = vadd.f32 %v2605_v29, %v2573_v35  ;;  %v2569_v58 = vmul.f32 %v4502_v28, %v2556_v31 }
 0x5d6   :  { %3391 = vmatprep.mubr.bf16.mxu1 %v2642_v52  ;;  %v2644_v32 = vpack.c.bf16 %v2633_v0, %v2632_v60  ;;  %v2636_v33 = vmax.f32 %v2620_v45, 0.0  ;;  %v2623_v12 = vadd.f32 %v2605_v29, %v2574_v17  ;;  %v2570_v23 = vmul.f32 %v4512_v5, %v2556_v31 }
 0x5d7   :  { %v2638_v63 = vmax.f32 %v2622_v27, 0.0  ;;  %v2643_v40 = vpack.c.bf16 %v2631_v14, %v2630_v34  ;;  %v2618_v38 = vadd.f32 %v2605_v29, %v2569_v58 }
 0x5d8   :  { %v2646_v43 = vpack.c.bf16 %v2637_v13, %v2636_v33  ;;  %v2639_v54 = vmax.f32 %v2623_v12, 0.0  ;;  %v2619_v11 = vadd.f32 %v2605_v29, %v2570_v23  ;;  %v2993_v33 = vld [vmem:[#allocation2] sm:$0x1] }
 0x5d9   :  { %v2634_v47 = vmax.f32 %v2618_v38, 0.0  ;;  %2996 = vperm.xlu1 %3480, %v2993_v33  }
 0x5da   :  { %v2647_v8 = vpack.c.bf16 %v2639_v54, %v2638_v63  ;;  %v2635_v61 = vmax.f32 %v2619_v11, 0.0 }
 0x5dc   :  { %v2645_v50 = vpack.c.bf16 %v2635_v61, %v2634_v47 }
 0x5dd   :  { %3392 = vmatmul.mubr.bf16.gmra.mxu1 %v2643_v40 }
 0x5de   :  { %3395 = vmatprep.mubr.bf16.mxu1 %v2644_v32 }
 0x5e5   :  { %3396 = vmatmul.mubr.bf16.gmra.mxu1 %v2645_v50 }
 0x5e6   :  { %3399 = vmatprep.mubr.bf16.mxu1 %v2646_v43 }
 0x5ed   :  { %3400 = vmatmul.mubr.bf16.gmra.mxu1 %v2647_v8 }
 0x695   :  { %v4577_v62 = vpop.f32.mrf.mxu1 }
 0x696   :  { %v2834_v53 = vmul.f32 %v4577_v62, %v4577_v62 }
 0x697   :  { %v4579_v28 = vpop.f32.mrf.mxu1 }
 0x698   :  { %v2832_v20 = vmul.f32 %v4579_v28, %v4579_v28 }
 0x699   :  { %v4581_v5 = vpop.f32.mrf.mxu1 }
 0x69a   :  { %v2835_v42 = vmul.f32 %v4581_v5, %v4581_v5 }
 0x69b   :  { %v4583_v31 = vpop.f32.mrf.mxu1 }
 0x69c   :  { %v2810_v6 = vadd.f32 %v4583_v31, %v4579_v28  ;;  %v2833_v18 = vmul.f32 %v4583_v31, %v4583_v31 }
 0x69d   :  { %v4591_v56 = vpop.f32.mrf.mxu1 }
 0x69e   :  { %v2811_v29 = vadd.f32 %v4577_v62, %v2810_v6  ;;  %v2848_v39 = vadd.f32 %v2833_v18, %v2832_v20  ;;  %v2838_v10 = vmul.f32 %v4591_v56, %v4591_v56 }
 0x69f   :  { %v4596_v36 = vpop.f32.mrf.mxu1 }
 0x6a0   :  { %v2849_v55 = vadd.f32 %v2848_v39, %v2834_v53  ;;  %v2812_v16 = vadd.f32 %v4581_v5, %v2811_v29  ;;  %v2836_v30 = vmul.f32 %v4596_v36, %v4596_v36 }
 0x6a1   :  { %v4601_v51 = vpop.f32.mrf.mxu1 }
 0x6a2   :  { %v2813_v2 = vadd.f32 %v2812_v16, %v4596_v36  ;;  %v2850_v22 = vadd.f32 %v2849_v55, %v2835_v42  ;;  %v2839_v57 = vmul.f32 %v4601_v51, %v4601_v51 }
 0x6a3   :  { %v4606_v26 = vpop.f32.mrf.mxu1 }
 0x6a4   :  { %v2851_v19 = vadd.f32 %v2850_v22, %v2836_v30  ;;  %v2814_v25 = vadd.f32 %v2813_v2, %v4606_v26  ;;  %v2837_v9 = vmul.f32 %v4606_v26, %v4606_v26 }
 0x6a5   :  { %v4611_v24 = vpop.f32.mrf.mxu1 }
 0x6a6   :  { %v2815_v46 = vadd.f32 %v4591_v56, %v2814_v25  ;;  %v2852_v21 = vadd.f32 %v2851_v19, %v2837_v9  ;;  %v2842_v17 = vmul.f32 %v4611_v24, %v4611_v24 }
 0x6a7   :  { %v4616_v1 = vpop.f32.mrf.mxu1 }
 0x6a8   :  { %v2853_v37 = vadd.f32 %v2852_v21, %v2838_v10  ;;  %v2816_v48 = vadd.f32 %v4601_v51, %v2815_v46  ;;  %v2840_v60 = vmul.f32 %v4616_v1, %v4616_v1 }
 0x6a9   :  { %v4621_v44 = vpop.f32.mrf.mxu1 }
 0x6aa   :  { %v2817_v52 = vadd.f32 %v2816_v48, %v4616_v1  ;;  %v2854_v0 = vadd.f32 %v2853_v37, %v2839_v57  ;;  %v2843_v12 = vmul.f32 %v4621_v44, %v4621_v44 }
 0x6ab   :  { %v4626_v4 = vpop.f32.mrf.mxu1 }
 0x6ac   :  { %v2855_v35 = vadd.f32 %v2854_v0, %v2840_v60  ;;  %v2818_v32 = vadd.f32 %v2817_v52, %v4626_v4  ;;  %v2841_v45 = vmul.f32 %v4626_v4, %v4626_v4  ;;  %v143_v0 = vsub.s32 6, %v3844_v41 }
 0x6ad   :  { %v4631_v13 = vpop.f32.mrf.mxu1 }
 0x6ae   :  { %v2819_v34 = vadd.f32 %v4611_v24, %v2818_v32  ;;  %v2856_v14 = vadd.f32 %v2855_v35, %v2841_v45  ;;  %v2846_v61 = vmul.f32 %v4631_v13, %v4631_v13  ;;  %v3537_v35 = vld [vmem:[%s4703_s4] sm:$0xff] }
 0x6af   :  { %v4636_v27 = vpop.f32.mrf.mxu1  ;;  %v144_v32 = vrot.slane %v3537_v35, %v143_v0 }
 0x6b0   :  { %v2857_v58 = vadd.f32 %v2856_v14, %v2842_v17  ;;  %v2820_v23 = vadd.f32 %v4621_v44, %v2819_v34  ;;  %v2844_v54 = vmul.f32 %v4636_v27, %v4636_v27 }
 0x6b1   :  { %v3402_v63 = vpop.f32.mrf.mxu1  ;;  %v466_v45 = vadd.f32 %v4071_v15, %v144_v32 }
 0x6b2   :  { %v2821_v43 = vadd.f32 %v2820_v23, %v4636_v27  ;;  %v2858_v40 = vadd.f32 %v2857_v58, %v2843_v12  ;;  %v2847_v6 = vmul.f32 %v3402_v63, %v3402_v63 }
 0x6b3   :  { %v2798_v38 = vpop.f32.mrf.mxu1 }
 0x6b4   :  { %v2859_v11 = vadd.f32 %v2858_v40, %v2844_v54  ;;  %v2822_v8 = vadd.f32 %v2821_v43, %v2798_v38  ;;  %v2845_v47 = vmul.f32 %v2798_v38, %v2798_v38 }
 0x6b6   :  { %v2823_v50 = vadd.f32 %v4631_v13, %v2822_v8  ;;  %v2860_v20 = vadd.f32 %v2859_v11, %v2845_v47 }
 0x6b8   :  { %v2824_v18 = vadd.f32 %v3402_v63, %v2823_v50  ;;  %v2861_v53 = vadd.f32 %v2860_v20, %v2846_v61 }
 0x6ba   :  { %v2825_v29 = vrot.slane %v2824_v18, 4  ;;  %v2862_v39 = vadd.f32 %v2861_v53, %v2847_v6 }
 0x6bc   :  { %v2826_v42 = vadd.f32 %v2825_v29, %v2824_v18  ;;  %v2863_v55 = vrot.slane %v2862_v39, 4 }
 0x6be   :  { %v2827_v16 = vrot.slane %v2826_v42, 2  ;;  %v2864_v2 = vadd.f32 %v2863_v55, %v2862_v39 }
 0x6c0   :  { %v2828_v30 = vadd.f32 %v2827_v16, %v2826_v42  ;;  %v2865_v22 = vrot.slane %v2864_v2, 2 }
 0x6c2   :  { %v2829_v19 = vrot.slane %v2828_v30, 1  ;;  %v2866_v25 = vadd.f32 %v2865_v22, %v2864_v2 }
 0x6c4   :  { %v2830_v9 = vadd.f32 %v2829_v19, %v2828_v30  ;;  %v2867_v10 = vrot.slane %v2866_v25, 1 }
 0x6c6   :  { %v2831_v46 = vmul.f32 0.0078125, %v2830_v9  ;;  %v2868_v21 = vadd.f32 %v2867_v10, %v2866_v25 }
 0x6c8   :  { %v2869_v57 = vmul.f32 0.0078125, %v2868_v21  ;;  %v2870_v37 = vmul.f32 %v2831_v46, %v2831_v46 }
 0x6ca   :  { %v2871_v48 = vsub.f32 %v2869_v57, %v2870_v37 }
 0x6cc   :  { %v2872_v52 = vmax.f32 %v2871_v48, 0.0 }
 0x6ce   :  { %v2873_v60 = vadd.f32 1e-05, %v2872_v52 }
 0x6d0   :  { %3532 = vrsqrt.f32 %v2873_v60 }
 0x6dd   :  { %v3533_v17 = vpop.eup %3532 }
 0x6de   :  { %v2875_v34 = vmul.f32 %v3533_v17, %v466_v45 }
 0x6e0   :  { %v2876_v14 = vmul.f32 %v2875_v34, %v2831_v46  ;;  %v2885_v33 = vrot.slane %v2875_v34, %v3861_v59 }
 0x6e2   :  { %v2877_v12 = vsub.f32 %v4241_v7, %v2876_v14  ;;  %v2886_v58 = vcombine.high %v2885_v33, %v2885_v33  ;;  %v2893_v23 = vrot.slane %v2885_v33, %v3861_v59  ;;  %v2992_v14 = vld [vmem:[%s4705_s6] sm:$0x1]  ;;  %v2997_v33 = vpop.permute.xlu1 %2996 }
 0x6e4   :  { %v2900_v43 = vrot.slane %v2886_v58, %v3861_v59  ;;  %v2904_v41 = vrot.slane %v2893_v23, %v3849_v49  ;;  %v2934_v54 = vrot.slane %v2877_v12, %v3861_v59  ;;  %v3002_v12 = vrot.slane %v2997_v33, %v3849_v49 }
 0x6e6   :  { %v2908_v40 = vrot.slane %v2900_v43, %v3849_v49  ;;  %v2935_v11 = vcombine.high %v2934_v54, %v2934_v54  ;;  %v2942_v15 = vrot.slane %v2934_v54, %v3861_v59  ;;  %v2918_v8 = vmul.f32 %v4601_v51, %v2904_v41 }
 0x6e7   :  { %v2917_v47 = vmul.f32 %v4591_v56, %v2904_v41  ;;  %v2916_v7 = vmul.f32 %v2904_v41, %v4606_v26  ;;  %v2915_v61 = vmul.f32 %v2904_v41, %v4596_v36  ;;  %v2914_v50 = vmul.f32 %v4581_v5, %v2904_v41 }
 0x6e8   :  { %v2924_v20 = vmul.f32 %v2908_v40, %v2798_v38  ;;  %v2949_v6 = vrot.slane %v2935_v11, %v3861_v59  ;;  %v2953_v18 = vrot.slane %v2942_v15, %v3849_v49  ;;  %v2926_v53 = vmul.f32 %v3402_v63, %v2908_v40 }
 0x6e9   :  { %v2925_v29 = vmul.f32 %v4631_v13, %v2908_v40  ;;  %v2923_v39 = vmul.f32 %v2908_v40, %v4636_v27  ;;  %v2922_v51 = vmul.f32 %v4621_v44, %v2908_v40  ;;  %v2921_v56 = vmul.f32 %v4611_v24, %v2908_v40 }
 0x6ea   :  { %v2957_v26 = vrot.slane %v2949_v6, %v3849_v49  ;;  %v2920_v36 = vmul.f32 %v2908_v40, %v4626_v4  ;;  %v2919_v5 = vmul.f32 %v2908_v40, %v4616_v1  ;;  %v2967_v38 = vadd.f32 %v2953_v18, %v2918_v8 }
 0x6eb   :  { %v2966_v42 = vadd.f32 %v2953_v18, %v2917_v47  ;;  %v2965_v59 = vadd.f32 %v2953_v18, %v2916_v7  ;;  %v2964_v55 = vadd.f32 %v2953_v18, %v2915_v61  ;;  %v2963_v16 = vadd.f32 %v2953_v18, %v2914_v50 }
 0x6ec   :  { %v2973_v63 = vadd.f32 %v2957_v26, %v2924_v20  ;;  %v2975_v2 = vadd.f32 %v2957_v26, %v2926_v53  ;;  %v2974_v13 = vadd.f32 %v2957_v26, %v2925_v29  ;;  %v2972_v30 = vadd.f32 %v2957_v26, %v2923_v39 }
 0x6ed   :  { %v2971_v27 = vadd.f32 %v2957_v26, %v2922_v51  ;;  %v2970_v22 = vadd.f32 %v2957_v26, %v2921_v56  ;;  %v2969_v44 = vadd.f32 %v2957_v26, %v2920_v36  ;;  %v2968_v19 = vadd.f32 %v2957_v26, %v2919_v5 }
 0x6ee   :  { %v2991_v24 = vmax.f32 %v2975_v2, 0.0  ;;  %v2913_v4 = vmul.f32 %v4577_v62, %v2904_v41  ;;  %v2912_v1 = vmul.f32 %v2904_v41, %v4583_v31  ;;  %v2911_v25 = vmul.f32 %v2904_v41, %v4579_v28 }
 0x6ef   :  { %v2990_v9 = vmax.f32 %v2974_v13, 0.0  ;;  %v2989_v57 = vmax.f32 %v2973_v63, 0.0  ;;  %v2988_v37 = vmax.f32 %v2972_v30, 0.0  ;;  %v2987_v62 = vmax.f32 %v2971_v27, 0.0 }
 0x6f0   :  { %3404 = vmatpush3.xpose.msra.mxu0 %v2991_v24  ;;  %v2962_v10 = vadd.f32 %v2953_v18, %v2913_v4  ;;  %v2961_v46 = vadd.f32 %v2953_v18, %v2912_v1  ;;  %v2960_v21 = vadd.f32 %v2953_v18, %v2911_v25  ;;  %v2986_v28 = vmax.f32 %v2970_v22, 0.0 }
 0x6f1   :  { %3405 = vmatprep.subr.mxu0 %v3590_v3  ;;  %v2985_v31 = vmax.f32 %v2969_v44, 0.0  ;;  %v2984_v48 = vmax.f32 %v2968_v19, 0.0  ;;  %v2983_v52 = vmax.f32 %v2967_v38, 0.0  ;;  %v2982_v60 = vmax.f32 %v2966_v42, 0.0 }
 0x6f2   :  { %v2981_v0 = vmax.f32 %v2965_v59, 0.0  ;;  %v2980_v35 = vmax.f32 %v2964_v55, 0.0  ;;  %v2979_v32 = vmax.f32 %v2963_v16, 0.0  ;;  %v2978_v45 = vmax.f32 %v2962_v10, 0.0 }
 0x6f3   :  { %v2977_v17 = vmax.f32 %v2961_v46, 0.0  ;;  %v2976_v34 = vmax.f32 %v2960_v21, 0.0 }
 0x6f4   :  { %3406 = vmatpush3.xpose.msra.mxu0 %v2990_v9 }
 0x6f5   :  { %3407 = vmatprep.subr.mxu0 %v3590_v3 }
 0x6f8   :  { %3408 = vmatpush3.xpose.msra.mxu0 %v2989_v57 }
 0x6f9   :  { %3409 = vmatprep.subr.mxu0 %v3590_v3 }
 0x6fc   :  { %3410 = vmatpush3.xpose.msra.mxu0 %v2988_v37 }
 0x6fd   :  { %3411 = vmatprep.subr.mxu0 %v3590_v3 }
 0x700   :  { %3412 = vmatpush3.xpose.msra.mxu0 %v2987_v62 }
 0x701   :  { %3413 = vmatprep.subr.mxu0 %v3590_v3 }
 0x704   :  { %3414 = vmatpush3.xpose.msra.mxu0 %v2986_v28 }
 0x705   :  { %3415 = vmatprep.subr.mxu0 %v3590_v3 }
 0x708   :  { %3416 = vmatpush3.xpose.msra.mxu0 %v2985_v31 }
 0x709   :  { %3417 = vmatprep.subr.mxu0 %v3590_v3 }
 0x70c   :  { %3418 = vmatpush3.xpose.msra.mxu0 %v2984_v48 }
 0x70d   :  { %3419 = vmatprep.subr.mxu0 %v3590_v3 }
 0x710   :  { %3420 = vmatpush3.xpose.msra.mxu0 %v2983_v52 }
 0x711   :  { %3421 = vmatprep.subr.mxu0 %v3590_v3 }
 0x714   :  { %3422 = vmatpush3.xpose.msra.mxu0 %v2982_v60 }
 0x715   :  { %3423 = vmatprep.subr.mxu0 %v3590_v3 }
 0x718   :  { %3424 = vmatpush3.xpose.msra.mxu0 %v2981_v0 }
 0x719   :  { %3425 = vmatprep.subr.mxu0 %v3590_v3 }
 0x71c   :  { %3426 = vmatpush3.xpose.msra.mxu0 %v2980_v35 }
 0x71d   :  { %3427 = vmatprep.subr.mxu0 %v3590_v3 }
 0x720   :  { %3428 = vmatpush3.xpose.msra.mxu0 %v2979_v32 }
 0x721   :  { %3429 = vmatprep.subr.mxu0 %v3590_v3 }
 0x724   :  { %3430 = vmatpush3.xpose.msra.mxu0 %v2978_v45 }
 0x725   :  { %3431 = vmatprep.subr.mxu0 %v3590_v3 }
 0x728   :  { %3432 = vmatpush3.xpose.msra.mxu0 %v2977_v17 }
 0x729   :  { %3433 = vmatprep.subr.mxu0 %v3590_v3 }
 0x72c   :  { %3434 = vmatpush3.xpose.msra.mxu0 %v2976_v34 }
 0x72f   :  { %3436 = vmatmul.mubr.f32.vlgmr.msra.gmra.mxu0 %v2992_v14 }
 0x7ef   :  { %v3069_v58 = vpop.f32.mrf.mxu0 }
 0x7f0   :  { %v3070_v23 = vadd.f32 %v3069_v58, %v3002_v12 }
 0x7f1   :  { %v3437_v43 = vpop.f32.mrf.mxu0 }
 0x7f2   :  { %3073 = vst [vmem:[%s4707_s8] sm:$0x1] %v3070_v23 }
 0x7f3   :  { %3078 = vsyncpa [#allocation4], 1 }
 0x7f4   :  { %3079 = vsyncpa [#allocation6], 1 }

</bundles_post_ra>
